<compile_context>
chip_gen: v6e
topology: v6e:2x2x1
jax: 0.10.0
libtpu: 0.0.40
codegen_flags: <defaults>
</compile_context>

<pallas_src>
import math
import jax
import jax.numpy as jnp
from jax.experimental import pallas as pl
from jax.experimental.pallas import tpu as pltpu

# ---- model dims (mirror the PyTorch module) ---------------------------------
LATENT = 2                    # latent_features
H1, H2, H3 = 256, 128, 64     # encoder hidden sizes (decoder mirrors them)
MAX_BATCH_TILE = 256          # rows per grid step (one LHS push on 256x256 MXU)
SPLIT_BATCH_AT = 128          # if B >= this, force >=2 grid steps (2nd TC on v7x)
PACK_W = 128                  # lane width of the packed [mu|log_sigma|z] output


def _round_up(n, m):
    return ((n + m - 1) // m) * m


# ---- parameters --------------------------------------------------------------
def make_params(key, obs_features):
    """(W [in,out], b [out]) for the 8 Linear layers in forward order:
    encoder L1..L4 (L4 -> 2*LATENT), decoder L1..L4.
    Init matches torch.nn.Linear default U(-k, k), k = 1/sqrt(fan_in)."""
    dims = [(obs_features, H1), (H1, H2), (H2, H3), (H3, 2 * LATENT),
            (LATENT, H3), (H3, H2), (H2, H1), (H1, obs_features)]
    keys = jax.random.split(key, len(dims))
    layers = []
    for k, (fi, fo) in zip(keys, dims):
        kw, kb = jax.random.split(k)
        bound = 1.0 / math.sqrt(fi)
        w = jax.random.uniform(kw, (fi, fo), jnp.float32, -bound, bound)
        b = jax.random.uniform(kb, (fo,), jnp.float32, -bound, bound)
        layers.append((w, b))
    return layers


def pack_params(layers, w_dtype=jnp.bfloat16):
    """All 8 weights -> one bf16 slab, all 8 biases -> one f32 slab (2 parameter
    inputs / DMAs).  Weight row offsets are 16-aligned so bf16 sublane tiles of
    every static slice stay aligned (no relayout copies inside the kernel)."""
    fan_outs = [w.shape[1] for w, _ in layers]
    cmax = _round_up(max(fan_outs + [128]), 128)            # slab lane width
    align = 16 if w_dtype == jnp.bfloat16 else 8
    w_blocks, offs, off = [], [], 0
    for w, _ in layers:
        fi, fo = w.shape
        r = _round_up(fi, align)
        w_blocks.append(jnp.pad(w, ((0, r - fi), (0, cmax - fo))).astype(w_dtype))
        offs.append(off)
        off += r
    w_slab = jnp.concatenate(w_blocks, axis=0)               # [sum(r_i), cmax] bf16

    b_rows = []
    for _, b in layers:
        row = jnp.pad(b, (0, cmax - b.shape[0]))[None, :]
        b_rows.append(jnp.concatenate([row, jnp.zeros((7, cmax), jnp.float32)], 0))
    b_slab = jnp.concatenate(b_rows, axis=0)                  # [8*n_layers, cmax] f32
    return w_slab, b_slab, tuple(offs)


# ---- forward -----------------------------------------------------------------
def vae_forward(x, eps, layers):
    """VAE forward (encoder -> reparameterized z -> decoder) in one pallas_call.

    Returns a dict mirroring the PyTorch module's outputs:
      qz: (mu, log_sigma) of the posterior
      pz: (mu, log_sigma) of the prior N(0, I) (zero prior_params buffer)
      z : reparameterized sample  z = mu + exp(log_sigma) * eps
      px_logits: Bernoulli logits from the decoder
    """
    B, F = x.shape
    f32, bf16 = jnp.float32, jnp.bfloat16
    w_slab, b_slab, offs = pack_params(layers)
    shapes = [(w.shape[0], w.shape[1]) for w, _ in layers]   # static (fan_in, fan_out)
    LOGIT_W = _round_up(max(F, 1), 128)                      # lane-dense logits width

    # -- batch tiling: 8-aligned tiles; split >=2 ways for large B (v7x 2 TCs) --
    if B >= SPLIT_BATCH_AT:
        TB = min(MAX_BATCH_TILE, _round_up(-(-B // 2), 8))
    else:
        TB = min(_round_up(max(B, 1), 8), MAX_BATCH_TILE)
    Bp = _round_up(B, TB)

    # fold eps into x as two extra columns -> one batch-tile input DMA
    xe = jnp.concatenate([x, eps], axis=1)                    # [B, F + LATENT]
    if Bp != B:
        xe = jnp.pad(xe, ((0, Bp - B), (0, 0)))
    grid = (Bp // TB,)

    def kernel(xe_ref, w_ref, b_ref, packed_ref, logits_ref):
        def bias(i, ncols=None):                 # static view into the bias slab
            n = shapes[i][1] if ncols is None else ncols
            return b_ref[8 * i:8 * i + 1, 0:n]

        def dense(h, i, ncols=None):             # bf16 MXU matmul, f32 accumulate
            fi, fo = shapes[i]
            n = fo if ncols is None else ncols
            o = offs[i]
            w = w_ref[o:o + fi, 0:n]                                    # bf16
            return jnp.dot(h.astype(bf16), w, preferred_element_type=f32) + bias(i, n)

        xb = xe_ref[:, 0:F]
        eps_b = xe_ref[:, F:F + LATENT]

        # ---------------- encoder: (Linear + Tanh) x3, fused [mu|log_sigma] head
        h = jnp.tanh(dense(xb, 0))
        h = jnp.tanh(dense(h, 1))
        h = jnp.tanh(dense(h, 2))
        head = dense(h, 3)                                    # [TB, 2*LATENT]
        mu = head[:, :LATENT]
        log_sigma = head[:, LATENT:]

        # ---------------- reparameterization: z = mu + exp(log_sigma) * eps
        z = mu + jnp.exp(log_sigma) * eps_b

        # one unmasked 128-lane store: [mu | log_sigma | z | 0 ...]
        pad = jnp.zeros((head.shape[0], PACK_W - 3 * LATENT), f32)
        packed_ref[...] = jnp.concatenate([head, z, pad], axis=-1)

        # ---------------- decoder
        # first layer has K = LATENT = 2: broadcast FMAs on the VPU (f32 path)
        o4 = offs[4]
        dw1 = w_ref[o4:o4 + LATENT, 0:H3]                     # [2, H3] bf16 -> f32 promote
        d = z[:, 0:1] * dw1[0:1, :] + z[:, 1:2] * dw1[1:2, :] + bias(4)
        d = jnp.tanh(d)
        d = jnp.tanh(dense(d, 5))
        d = jnp.tanh(dense(d, 6))
        # lane-dense logits: compute against zero-padded columns [0:LOGIT_W]
        logits_ref[...] = dense(d, 7, ncols=LOGIT_W)

    packed, logits = pl.pallas_call(
        kernel,
        out_shape=(
            jax.ShapeDtypeStruct((Bp, PACK_W), f32),          # [mu | log_sigma | z | 0]
            jax.ShapeDtypeStruct((Bp, LOGIT_W), f32),         # lane-dense logits
        ),
        grid=grid,
        in_specs=[
            pl.BlockSpec((TB, F + LATENT), lambda i: (i, 0)),  # [x | eps] batch tile
            pl.BlockSpec(w_slab.shape, lambda i: (0, 0)),      # bf16 weight slab: resident
            pl.BlockSpec(b_slab.shape, lambda i: (0, 0)),      # f32 bias slab: resident
        ],
        out_specs=(
            pl.BlockSpec((TB, PACK_W), lambda i: (i, 0)),
            pl.BlockSpec((TB, LOGIT_W), lambda i: (i, 0)),
        ),
        compiler_params=pltpu.CompilerParams(
            dimension_semantics=("parallel",)),                # shard tiles on v7x cores
    )(xe, w_slab, b_slab)

    mu = packed[:B, :LATENT]
    log_sigma = packed[:B, LATENT:2 * LATENT]
    z = packed[:B, 2 * LATENT:3 * LATENT]
    px_logits = logits[:B, :F]

    # prior p(z) = N(0, I): prior_params buffer is zeros(1, 2*latent), expanded
    pz_mu = jnp.zeros((B, LATENT), f32)
    pz_log_sigma = jnp.zeros((B, LATENT), f32)

    return {"qz": (mu, log_sigma), "pz": (pz_mu, pz_log_sigma),
            "z": z, "px_logits": px_logits}


# ---- references for correctness checking --------------------------------------
def reference_forward(x, eps, layers):
    """Pure-f32 reference (torch-equivalent math)."""
    (w1, b1), (w2, b2), (w3, b3), (w4, b4), (v1, c1), (v2, c2), (v3, c3), (v4, c4) = layers
    h = jnp.tanh(x @ w1 + b1)
    h = jnp.tanh(h @ w2 + b2)
    h = jnp.tanh(h @ w3 + b3)
    head = h @ w4 + b4
    mu, log_sigma = head[:, :LATENT], head[:, LATENT:]
    z = mu + jnp.exp(log_sigma) * eps
    d = jnp.tanh(z @ v1 + c1)
    d = jnp.tanh(d @ v2 + c2)
    d = jnp.tanh(d @ v3 + c3)
    logits = d @ v4 + c4
    return mu, log_sigma, z, logits


def matched_reference(x, eps, layers):
    """Reference with the kernel's numerics: bf16 MXU operands, f32 accumulation,
    f32 VPU path for the K=2 decoder layer."""
    f32, bf16 = jnp.float32, jnp.bfloat16

    def lin(h, w, b):
        return jnp.dot(h.astype(bf16), w.astype(bf16),
                       preferred_element_type=f32) + b

    (w1, b1), (w2, b2), (w3, b3), (w4, b4), (v1, c1), (v2, c2), (v3, c3), (v4, c4) = layers
    h = jnp.tanh(lin(x, w1, b1))
    h = jnp.tanh(lin(h, w2, b2))
    h = jnp.tanh(lin(h, w3, b3))
    head = lin(h, w4, b4)
    mu, log_sigma = head[:, :LATENT], head[:, LATENT:]
    z = mu + jnp.exp(log_sigma) * eps
    v1q = v1.astype(bf16).astype(f32)
    d = jnp.tanh(z[:, 0:1] * v1q[0:1, :] + z[:, 1:2] * v1q[1:2, :] + c1)
    d = jnp.tanh(lin(d, v2, c2))
    d = jnp.tanh(lin(d, v3, c3))
    logits = lin(d, v4, c4)
    return mu, log_sigma, z, logits


if __name__ == "__main__":
    key = jax.random.PRNGKey(0)
    k_x, k_eps, k_p = jax.random.split(key, 3)

    batch = 64
    obs_features = 32   # batch_cols: flattened observation features

    # input already flattened to [B, F] (the module does x.view(x.size(0), -1))
    x = jax.random.normal(k_x, (batch, obs_features), jnp.float32)
    # eps ~ N(0, 1) for the reparameterization trick (deterministic here)
    eps = jax.random.normal(k_eps, (batch, LATENT), jnp.float32)

    layers = make_params(k_p, obs_features)

    out = jax.block_until_ready(vae_forward(x, eps, layers))

    # tight check against a reference that uses the same bf16-MXU numerics
    mu_m, ls_m, z_m, lg_m = matched_reference(x, eps, layers)
    assert jnp.allclose(out["qz"][0], mu_m, atol=2e-3), "mu mismatch"
    assert jnp.allclose(out["qz"][1], ls_m, atol=2e-3), "log_sigma mismatch"
    assert jnp.allclose(out["z"], z_m, atol=2e-3), "z mismatch"
    assert jnp.allclose(out["px_logits"], lg_m, atol=2e-3), "logits mismatch"

    # loose sanity check against the pure-f32 reference (bf16 weight quantization)
    _, _, _, lg_r = reference_forward(x, eps, layers)
    assert jnp.allclose(out["px_logits"], lg_r, atol=0.25), "logits far from f32 reference"

    print("KERNEL_OK")
</pallas_src>

<mosaic_0001>
module attributes {stable_mosaic.version = 11 : i64} {
  func.func @kernel(%arg0: i32, %arg1: memref<64x34xf32, #tpu.memory_space<vmem>>, %arg2: memref<944x256xbf16, #tpu.memory_space<vmem>>, %arg3: memref<64x256xf32, #tpu.memory_space<vmem>>, %arg4: memref<64x128xf32, #tpu.memory_space<vmem>>, %arg5: memref<64x128xf32, #tpu.memory_space<vmem>>) attributes {dimension_semantics = [#tpu.dimension_semantics<parallel>], iteration_bounds = array<i64: 1>, scalar_prefetch = 0 : i64, scratch_operands = 0 : i64, tpu.core_type = #tpu.core_type<tc>, window_params = [{transform_indices = @transform_0, window_bounds = array<i64: 64, 34>}, {pipeline_mode = #tpu.pipeline_mode<synchronous>, transform_indices = @transform_1, window_bounds = array<i64: 944, 256>}, {pipeline_mode = #tpu.pipeline_mode<synchronous>, transform_indices = @transform_2, window_bounds = array<i64: 64, 256>}, {transform_indices = @transform_3, window_bounds = array<i64: 64, 128>}, {transform_indices = @transform_4, window_bounds = array<i64: 64, 128>}]} {
    %c0 = arith.constant 0 : index
    %c0_0 = arith.constant 0 : index
    %0 = vector.load %arg1[%c0, %c0_0] : memref<64x34xf32, #tpu.memory_space<vmem>>, vector<64x32xf32>
    %c0_1 = arith.constant 0 : index
    %c32 = arith.constant 32 : index
    %1 = vector.load %arg1[%c0_1, %c32] : memref<64x34xf32, #tpu.memory_space<vmem>>, vector<64x2xf32>
    %c0_2 = arith.constant 0 : index
    %c0_3 = arith.constant 0 : index
    %2 = vector.load %arg2[%c0_2, %c0_3] : memref<944x256xbf16, #tpu.memory_space<vmem>>, vector<32x256xbf16>
    %3 = arith.truncf %0 : vector<64x32xf32> to vector<64x32xbf16>
    %cst = arith.constant dense<0.000000e+00> : vector<64x256xf32>
    %4 = tpu.matmul %3, %2, %cst {dimension_numbers = #tpu.dot_dimension_numbers<[1], [0], [0], [1], [0, 0, 1, 1], [], []>} : vector<64x32xbf16>, vector<32x256xbf16>, vector<64x256xf32> -> vector<64x256xf32>
    %c0_4 = arith.constant 0 : index
    %c0_5 = arith.constant 0 : index
    %5 = vector.load %arg3[%c0_4, %c0_5] : memref<64x256xf32, #tpu.memory_space<vmem>>, vector<1x256xf32>
    %6 = vector.broadcast %5 : vector<1x256xf32> to vector<64x256xf32>
    %7 = arith.addf %4, %6 : vector<64x256xf32>
    %8 = math.tanh %7 : vector<64x256xf32>
    %c32_6 = arith.constant 32 : index
    %c0_7 = arith.constant 0 : index
    %9 = vector.load %arg2[%c32_6, %c0_7] : memref<944x256xbf16, #tpu.memory_space<vmem>>, vector<256x128xbf16>
    %10 = arith.truncf %8 : vector<64x256xf32> to vector<64x256xbf16>
    %cst_8 = arith.constant dense<0.000000e+00> : vector<64x128xf32>
    %11 = tpu.matmul %10, %9, %cst_8 {dimension_numbers = #tpu.dot_dimension_numbers<[1], [0], [0], [1], [0, 0, 1, 1], [], []>} : vector<64x256xbf16>, vector<256x128xbf16>, vector<64x128xf32> -> vector<64x128xf32>
    %c8 = arith.constant 8 : index
    %c0_9 = arith.constant 0 : index
    %12 = vector.load %arg3[%c8, %c0_9] : memref<64x256xf32, #tpu.memory_space<vmem>>, vector<1x128xf32>
    %13 = vector.broadcast %12 : vector<1x128xf32> to vector<64x128xf32>
    %14 = arith.addf %11, %13 : vector<64x128xf32>
    %15 = math.tanh %14 : vector<64x128xf32>
    %c288 = arith.constant 288 : index
    %c0_10 = arith.constant 0 : index
    %16 = vector.load %arg2[%c288, %c0_10] : memref<944x256xbf16, #tpu.memory_space<vmem>>, vector<128x64xbf16>
    %17 = arith.truncf %15 : vector<64x128xf32> to vector<64x128xbf16>
    %cst_11 = arith.constant dense<0.000000e+00> : vector<64x64xf32>
    %18 = tpu.matmul %17, %16, %cst_11 {dimension_numbers = #tpu.dot_dimension_numbers<[1], [0], [0], [1], [0, 0, 1, 1], [], []>} : vector<64x128xbf16>, vector<128x64xbf16>, vector<64x64xf32> -> vector<64x64xf32>
    %c16 = arith.constant 16 : index
    %c0_12 = arith.constant 0 : index
    %19 = vector.load %arg3[%c16, %c0_12] : memref<64x256xf32, #tpu.memory_space<vmem>>, vector<1x64xf32>
    %20 = vector.broadcast %19 : vector<1x64xf32> to vector<64x64xf32>
    %21 = arith.addf %18, %20 : vector<64x64xf32>
    %22 = math.tanh %21 : vector<64x64xf32>
    %c416 = arith.constant 416 : index
    %c0_13 = arith.constant 0 : index
    %23 = vector.load %arg2[%c416, %c0_13] : memref<944x256xbf16, #tpu.memory_space<vmem>>, vector<64x4xbf16>
    %24 = arith.truncf %22 : vector<64x64xf32> to vector<64x64xbf16>
    %cst_14 = arith.constant dense<0.000000e+00> : vector<64x4xf32>
    %25 = tpu.matmul %24, %23, %cst_14 {dimension_numbers = #tpu.dot_dimension_numbers<[1], [0], [0], [1], [0, 0, 1, 1], [], []>} : vector<64x64xbf16>, vector<64x4xbf16>, vector<64x4xf32> -> vector<64x4xf32>
    %c24 = arith.constant 24 : index
    %c0_15 = arith.constant 0 : index
    %26 = vector.load %arg3[%c24, %c0_15] : memref<64x256xf32, #tpu.memory_space<vmem>>, vector<1x4xf32>
    %27 = vector.broadcast %26 : vector<1x4xf32> to vector<64x4xf32>
    %28 = arith.addf %25, %27 : vector<64x4xf32>
    %29 = vector.extract_strided_slice %28 {offsets = [0, 0], sizes = [64, 2], strides = [1, 1]} : vector<64x4xf32> to vector<64x2xf32>
    %30 = vector.extract_strided_slice %28 {offsets = [0, 2], sizes = [64, 2], strides = [1, 1]} : vector<64x4xf32> to vector<64x2xf32>
    %31 = math.exp %30 : vector<64x2xf32>
    %32 = arith.mulf %31, %1 : vector<64x2xf32>
    %33 = arith.addf %29, %32 : vector<64x2xf32>
    %cst_16 = arith.constant 0.000000e+00 : f32
    %34 = vector.broadcast %cst_16 : f32 to vector<64x122xf32>
    %35 = tpu.concatenate %28, %33, %34 in 1 : vector<64x4xf32>, vector<64x2xf32>, vector<64x122xf32> -> vector<64x128xf32>
    %c0_17 = arith.constant 0 : index
    %c0_18 = arith.constant 0 : index
    %36 = vector.load %arg4[%c0_17, %c0_18] : memref<64x128xf32, #tpu.memory_space<vmem>>, vector<64x128xf32>
    tpu.vector_store %arg4[%c0_17, %c0_18], %35 {strides = array<i32>} : memref<64x128xf32, #tpu.memory_space<vmem>>, vector<64x128xf32>,
    %c480 = arith.constant 480 : index
    %c0_19 = arith.constant 0 : index
    %37 = vector.load %arg2[%c480, %c0_19] : memref<944x256xbf16, #tpu.memory_space<vmem>>, vector<2x64xbf16>
    %38 = vector.extract_strided_slice %33 {offsets = [0, 0], sizes = [64, 1], strides = [1, 1]} : vector<64x2xf32> to vector<64x1xf32>
    %39 = vector.extract_strided_slice %37 {offsets = [0, 0], sizes = [1, 64], strides = [1, 1]} : vector<2x64xbf16> to vector<1x64xbf16>
    %40 = arith.extf %39 : vector<1x64xbf16> to vector<1x64xf32>
    %41 = vector.broadcast %38 : vector<64x1xf32> to vector<64x64xf32>
    %42 = vector.broadcast %40 : vector<1x64xf32> to vector<64x64xf32>
    %43 = arith.mulf %41, %42 : vector<64x64xf32>
    %44 = vector.extract_strided_slice %33 {offsets = [0, 1], sizes = [64, 1], strides = [1, 1]} : vector<64x2xf32> to vector<64x1xf32>
    %45 = vector.extract_strided_slice %37 {offsets = [1, 0], sizes = [1, 64], strides = [1, 1]} : vector<2x64xbf16> to vector<1x64xbf16>
    %46 = arith.extf %45 : vector<1x64xbf16> to vector<1x64xf32>
    %47 = vector.broadcast %44 : vector<64x1xf32> to vector<64x64xf32>
    %48 = vector.broadcast %46 : vector<1x64xf32> to vector<64x64xf32>
    %49 = arith.mulf %47, %48 : vector<64x64xf32>
    %50 = arith.addf %43, %49 : vector<64x64xf32>
    %c32_20 = arith.constant 32 : index
    %c0_21 = arith.constant 0 : index
    %51 = vector.load %arg3[%c32_20, %c0_21] : memref<64x256xf32, #tpu.memory_space<vmem>>, vector<1x64xf32>
    %52 = vector.broadcast %51 : vector<1x64xf32> to vector<64x64xf32>
    %53 = arith.addf %50, %52 : vector<64x64xf32>
    %54 = math.tanh %53 : vector<64x64xf32>
    %c496 = arith.constant 496 : index
    %c0_22 = arith.constant 0 : index
    %55 = vector.load %arg2[%c496, %c0_22] : memref<944x256xbf16, #tpu.memory_space<vmem>>, vector<64x128xbf16>
    %56 = arith.truncf %54 : vector<64x64xf32> to vector<64x64xbf16>
    %cst_23 = arith.constant dense<0.000000e+00> : vector<64x128xf32>
    %57 = tpu.matmul %56, %55, %cst_23 {dimension_numbers = #tpu.dot_dimension_numbers<[1], [0], [0], [1], [0, 0, 1, 1], [], []>} : vector<64x64xbf16>, vector<64x128xbf16>, vector<64x128xf32> -> vector<64x128xf32>
    %c40 = arith.constant 40 : index
    %c0_24 = arith.constant 0 : index
    %58 = vector.load %arg3[%c40, %c0_24] : memref<64x256xf32, #tpu.memory_space<vmem>>, vector<1x128xf32>
    %59 = vector.broadcast %58 : vector<1x128xf32> to vector<64x128xf32>
    %60 = arith.addf %57, %59 : vector<64x128xf32>
    %61 = math.tanh %60 : vector<64x128xf32>
    %c560 = arith.constant 560 : index
    %c0_25 = arith.constant 0 : index
    %62 = vector.load %arg2[%c560, %c0_25] : memref<944x256xbf16, #tpu.memory_space<vmem>>, vector<128x256xbf16>
    %63 = arith.truncf %61 : vector<64x128xf32> to vector<64x128xbf16>
    %cst_26 = arith.constant dense<0.000000e+00> : vector<64x256xf32>
    %64 = tpu.matmul %63, %62, %cst_26 {dimension_numbers = #tpu.dot_dimension_numbers<[1], [0], [0], [1], [0, 0, 1, 1], [], []>} : vector<64x128xbf16>, vector<128x256xbf16>, vector<64x256xf32> -> vector<64x256xf32>
    %c48 = arith.constant 48 : index
    %c0_27 = arith.constant 0 : index
    %65 = vector.load %arg3[%c48, %c0_27] : memref<64x256xf32, #tpu.memory_space<vmem>>, vector<1x256xf32>
    %66 = vector.broadcast %65 : vector<1x256xf32> to vector<64x256xf32>
    %67 = arith.addf %64, %66 : vector<64x256xf32>
    %68 = math.tanh %67 : vector<64x256xf32>
    %c688 = arith.constant 688 : index
    %c0_28 = arith.constant 0 : index
    %69 = vector.load %arg2[%c688, %c0_28] : memref<944x256xbf16, #tpu.memory_space<vmem>>, vector<256x128xbf16>
    %70 = arith.truncf %68 : vector<64x256xf32> to vector<64x256xbf16>
    %cst_29 = arith.constant dense<0.000000e+00> : vector<64x128xf32>
    %71 = tpu.matmul %70, %69, %cst_29 {dimension_numbers = #tpu.dot_dimension_numbers<[1], [0], [0], [1], [0, 0, 1, 1], [], []>} : vector<64x256xbf16>, vector<256x128xbf16>, vector<64x128xf32> -> vector<64x128xf32>
    %c56 = arith.constant 56 : index
    %c0_30 = arith.constant 0 : index
    %72 = vector.load %arg3[%c56, %c0_30] : memref<64x256xf32, #tpu.memory_space<vmem>>, vector<1x128xf32>
    %73 = vector.broadcast %72 : vector<1x128xf32> to vector<64x128xf32>
    %74 = arith.addf %71, %73 : vector<64x128xf32>
    %c0_31 = arith.constant 0 : index
    %c0_32 = arith.constant 0 : index
    %75 = vector.load %arg5[%c0_31, %c0_32] : memref<64x128xf32, #tpu.memory_space<vmem>>, vector<64x128xf32>
    tpu.vector_store %arg5[%c0_31, %c0_32], %74 {strides = array<i32>} : memref<64x128xf32, #tpu.memory_space<vmem>>, vector<64x128xf32>,
    return
  }
  func.func @transform_0(%arg0: i32) -> (i32, i32) {
    %c0_i32 = arith.constant 0 : i32
    %c0_i32_0 = arith.constant 0 : i32
    return %arg0, %c0_i32 : i32, i32
  }
  func.func @transform_1(%arg0: i32) -> (i32, i32) {
    %c0_i32 = arith.constant 0 : i32
    %c0_i32_0 = arith.constant 0 : i32
    %c0_i32_1 = arith.constant 0 : i32
    return %c0_i32, %c0_i32_0 : i32, i32
  }
  func.func @transform_2(%arg0: i32) -> (i32, i32) {
    %c0_i32 = arith.constant 0 : i32
    %c0_i32_0 = arith.constant 0 : i32
    %c0_i32_1 = arith.constant 0 : i32
    return %c0_i32, %c0_i32_0 : i32, i32
  }
  func.func @transform_3(%arg0: i32) -> (i32, i32) {
    %c0_i32 = arith.constant 0 : i32
    %c0_i32_0 = arith.constant 0 : i32
    return %arg0, %c0_i32 : i32, i32
  }
  func.func @transform_4(%arg0: i32) -> (i32, i32) {
    %c0_i32 = arith.constant 0 : i32
    %c0_i32_0 = arith.constant 0 : i32
    return %arg0, %c0_i32 : i32, i32
  }
}

</mosaic_0001>

<bundles_post_ra>
// kernel: tpu_custom_call.1
= control target key start
LH: loop header
LB: loop body
LE: loop exit
PB: predicated region body
PF: predicated region fallthrough
CT: control target
= control target key end

     0   :  { %10 = vsyncpa [#allocation3], 0  ;;  %s2333_s0 = inlined_call_operand.vmem [shape: f32[64,34], index: 0, kind: input, shape index: {}]   ;;  %s2334_s1 = inlined_call_operand.hbm [shape: bf16[944,256], index: 1, kind: input, shape index: {}]   ;;  %s2335_s2 = inlined_call_operand.hbm [shape: f32[64,256], index: 2, kind: input, shape index: {}]   ;;  %s2336_s3 = inlined_call_operand.hbm [shape: f32[64,128], index: 3, kind: output, shape index: {0}]   ;;  %s2337_s4 = inlined_call_operand.hbm [shape: f32[64,128], index: 4, kind: output, shape index: {1}]  }
   0x1   :  { %11 = vsyncpa [#allocation6], 0 }
   0x2   :  { %12 = vsyncpa [#allocation4], 0 }
   0x3   :  { %13 = vsyncpa [#allocation9], 0  ;;  %s2081_s15 = smov [#allocation2]  }
   0x4   :  { %s21_s16 = sshll.u32 %s2081_s15, 4  ;;  %s22_s16 = int_to_ptr.vmem [resolvable:$true] %s21_s16 }
   0x5   :  { %s2001_s17 = scalar_lea.vmem %s22_s16, 15104  ;;  %p2006_p1 = scmp.lt.s32.totalorder %s22_s16, %s22_s16 }
   0x6   :  { %p2002_p0 = scmp.ne.s32.totalorder %s22_s16, %s2001_s17  ;;  %p2007_p2 = scmp.lt.s32.totalorder %s2001_s17, %s2001_s17 }
   0x8   :  { %p2008_p3 = por %p2007_p2, %p2006_p1 }
   0xa   :  { %p2009_p4 = pnand %p2008_p3, %p2002_p0 }
   0xc   :  { %2012 = shalt.err (!%p2009_p4)
}
   0xd   :  { %s2082_s18 = smov 128   ;;  %s2083_s19 = smov 8  }
   0xe   :  { %27 = dma.hbm_to_vmem [thread:$0]  %s2334_s1, 15104, %s22_s16, [#allocation3], %s2082_s18, %s2082_s18, %s2083_s19  }
   0xf   :  { %s2084_s22 = smov [#allocation5]  }
  0x10   :  { %s33_s23 = sshll.u32 %s2084_s22, 4  ;;  %s34_s23 = int_to_ptr.vmem [resolvable:$true] %s33_s23 }
  0x11   :  { %s2021_s24 = scalar_lea.vmem %s34_s23, 2048  ;;  %p2026_p6 = scmp.lt.s32.totalorder %s34_s23, %s34_s23 }
  0x12   :  { %p2022_p5 = scmp.ne.s32.totalorder %s34_s23, %s2021_s24  ;;  %p2027_p7 = scmp.lt.s32.totalorder %s2021_s24, %s2021_s24 }
  0x14   :  { %p2028_p8 = por %p2027_p7, %p2026_p6 }
  0x16   :  { %p2029_p9 = pnand %p2028_p8, %p2022_p5 }
  0x18   :  { %2032 = shalt.err (!%p2029_p9)
}
  0x19   :  { %s2085_s25 = smov 256   ;;  %s2086_s26 = smov 16  }
  0x1a   :  { %39 = dma.hbm_to_vmem [thread:$0]  %s2335_s2, 2048, %s34_s23, [#allocation6], %s2085_s25, %s2085_s25, %s2086_s26  }
  0x1b   :  { %2073 = dma.done.wait [#allocation3], 15104  }
  0x1c   :  { %2074 = vsyncadd [#allocation3], 4294952192 }
  0x1d   :  { %2075 = dma.done.wait [#allocation6], 2048  }
  0x1e   :  { %2076 = vsyncadd [#allocation6], 4294965248  ;;  %v2087_v0 = vmov 0   ;;  %v1771_v1 = vld [vmem:[#allocation2 + $0x14] ss:$8 sps:$4 sm:$0xff]   ;;  %v2133_v5 = vld [vmem:[%s2333_s0] sm:$0xff]  ;;  %v65_v33 = vlaneseq }
  0x1f   :  { %140 = vmatprep.mubr.bf16.mxu0 %v2087_v0  ;;  %1758 = vset.pattern.permute.xlu1 %v2087_v0  ;;  %v1773_v2 = vld [vmem:[#allocation2 + $0x10] ss:$8 sps:$4 sm:$0xff]   ;;  %v1774_v3 = vld [vmem:[#allocation2 + $0x4] ss:$8 sps:$4 sm:$0xff]   ;;  %v1776_v4 = vld [vmem:[#allocation2] ss:$8 sps:$4 sm:$0xff]  }
  0x20   :  { %120 = vmatprep.subr.bf16.mxu0 %v1771_v1  ;;  %v2138_v6 = vld [vmem:[%s2333_s0 + $0x8] sm:$0xff]  ;;  %vm95_vm0 = vcmask 261120   ;;  %v1777_v8 = vld [vmem:[#allocation2 + $0x110] ss:$8 sps:$4 sm:$0xff]   ;;  %v2159_v15 = vld [vmem:[%s2333_s0 + $0x20] sm:$0xff]  ;;  %v66_v34 = vshrl.u32 %v65_v33, 7 }
  0x21   :  { %121 = vmatpush1.bf16.msra.mxu0 %v1773_v2  ;;  %v59_v7 = vpack.c.bf16 %v2138_v6, %v2133_v5  ;;  %v1778_v9 = vld [vmem:[#allocation2 + $0x90] ss:$8 sps:$4 sm:$0xff]   ;;  %1581 = vmatprep.subr.bf16.mxu1 %v1777_v8  ;;  %v1779_v10 = vld [vmem:[#allocation2 + $0x100] ss:$8 sps:$4 sm:$0xff]   ;;  %vm586_vm1 = vcmask 523264   ;;  %s2090_s17 = smov 126  }
  0x22   :  { %122 = vmatprep.subr.bf16.mxu0 %v1774_v3  ;;  %v2145_v11 = vld [vmem:[%s2333_s0 + $0x10] sm:$0xff]  ;;  %v2150_v12 = vld [vmem:[%s2333_s0 + $0x18] sm:$0xff]  ;;  %1582 = vmatpush3.bf16.msra.mxu1 %v1778_v9  ;;  %v1780_v13 = vld [vmem:[#allocation2 + $0x80] ss:$8 sps:$4 sm:$0xff]   ;;  %v2185_v35 = vsub.s32 1, %v66_v34  ;;  %v2187_v37 = vsub.s32 0, %v66_v34 }
  0x23   :  { %1583 = vmatprep.subr.bf16.mxu1 %v1779_v10  ;;  %v60_v14 = vpack.c.bf16 %v2150_v12, %v2145_v11  ;;  %v2164_v16 = vld [vmem:[%s2333_s0 + $0x28] sm:$0xff]  ;;  %v2173_v18 = vld [vmem:[%s2333_s0 + $0x30] sm:$0xff]  ;;  %v2178_v19 = vld [vmem:[%s2333_s0 + $0x38] sm:$0xff]  ;;  %s2088_s0 = smov 98   ;;  %s2091_s20 = smov 4   ;;  %vm792_vm2 = vcmask 31744  }
  0x24   :  { %v61_v17 = vpack.c.bf16 %v2164_v16, %v2159_v15  ;;  %v62_v20 = vpack.c.bf16 %v2178_v19, %v2173_v18  ;;  %v1781_v21 = vld [vmem:[#allocation2 + $0xf0] ss:$8 sps:$4 sm:$0xff]   ;;  %v1783_v23 = vld [vmem:[#allocation2 + $0xe0] ss:$8 sps:$4 sm:$0xff]   ;;  %692 = vrot.lane.b32.xlu1 %v2145_v11, %s2088_s0  ;;  %688 = vrot.lane.b32.xlu0 %v2133_v5, %s2088_s0  ;;  %vm801_vm3 = vcmask 48128   ;;  %s2092_s21 = smov [#allocation7]  }
  0x25   :  { %123 = vmatpush1.bf16.msra.mxu0 %v1776_v4  ;;  %v1782_v22 = vld [vmem:[#allocation2 + $0x70] ss:$8 sps:$4 sm:$0xff]   ;;  %v1784_v24 = vld [vmem:[#allocation2 + $0x60] ss:$8 sps:$4 sm:$0xff]   ;;  %s1472_s22 = sshll.u32 %s2092_s21, 4  ;;  %s1473_s22 = int_to_ptr.vmem [resolvable:$true] %s1472_s22 }
  0x26   :  { %1584 = vmatpush3.bf16.msra.mxu1 %v1780_v13  ;;  %v1785_v25 = vld [vmem:[#allocation2 + $0xd0] ss:$8 sps:$4 sm:$0xff]   ;;  %v1787_v27 = vld [vmem:[#allocation2 + $0xc0] ss:$8 sps:$4 sm:$0xff]   ;;  %s2033_s23 = scalar_lea.vmem %s1473_s22, 1024  ;;  %p2038_p11 = scmp.lt.s32.totalorder %s1473_s22, %s1473_s22 }
  0x27   :  { %1585 = vmatprep.subr.bf16.mxu1 %v1781_v21  ;;  %v1786_v26 = vld [vmem:[#allocation2 + $0x50] ss:$8 sps:$4 sm:$0xff]   ;;  %v1788_v28 = vld [vmem:[#allocation2 + $0x40] ss:$8 sps:$4 sm:$0xff]   ;;  %p2034_p10 = scmp.ne.s32.totalorder %s1473_s22, %s2033_s23  ;;  %p2039_p12 = scmp.lt.s32.totalorder %s2033_s23, %s2033_s23 }
  0x28   :  { %1505 = vmatmul.mubr.msk.bf16.vlgmr.msra.gmra.mxu0 %vm95_vm0, %v59_v7  ;;  %v1789_v29 = vld [vmem:[#allocation2 + $0xb0] ss:$8 sps:$4 sm:$0xff]   ;;  %v1791_v31 = vld [vmem:[#allocation2 + $0xa0] ss:$8 sps:$4 sm:$0xff]   ;;  %694 = vrot.lane.b32.xlu1 %v2150_v12, %s2088_s0 }
  0x29   :  { %150 = vmatprep.mubr.bf16.mxu0 %v2087_v0  ;;  %v1790_v30 = vld [vmem:[#allocation2 + $0x30] ss:$8 sps:$4 sm:$0xff]   ;;  %v1792_v32 = vld [vmem:[#allocation2 + $0x20] ss:$8 sps:$4 sm:$0xff]   ;;  %690 = vrot.lane.b32.xlu0 %v2138_v6, %s2088_s0  ;;  %p2040_p13 = por %p2039_p12, %p2038_p11 }
  0x2a   :  { %1586 = vmatpush3.bf16.msra.mxu1 %v1782_v22  ;;  %v63_v36 = vld [vmem:[#allocation5] ss:$8 sm:$0x3] }
  0x2b   :  { %1587 = vmatprep.subr.bf16.mxu1 %v1783_v23  ;;  %v72_v38 = vrot.slane %v63_v36, %v2185_v35  ;;  %v68_v40 = vrot.slane %v63_v36, %v2187_v37  ;;  %p2041_p0 = pnand %p2040_p13, %p2034_p10 }
  0x2c   :  { %698 = vrot.lane.b32.xlu1 %v2164_v16, %s2088_s0 }
  0x2d   :  { %696 = vrot.lane.b32.xlu0 %v2159_v15, %s2088_s0 }
  0x2e   :  { %1588 = vmatpush3.bf16.msra.mxu1 %v1784_v24 }
  0x2f   :  { %1589 = vmatprep.subr.bf16.mxu1 %v1785_v25 }
  0x30   :  { %1506 = vmatmul.mubr.msk.bf16.gmra.mxu0 %vm95_vm0, %v60_v14  ;;  %702 = vrot.lane.b32.xlu1 %v2178_v19, %s2088_s0 }
  0x31   :  { %160 = vmatprep.mubr.bf16.mxu0 %v2087_v0  ;;  %700 = vrot.lane.b32.xlu0 %v2173_v18, %s2088_s0 }
  0x32   :  { %1590 = vmatpush3.bf16.msra.mxu1 %v1786_v26 }
  0x33   :  { %1591 = vmatprep.subr.bf16.mxu1 %v1787_v27 }
  0x36   :  { %1592 = vmatpush3.bf16.msra.mxu1 %v1788_v28 }
  0x37   :  { %1593 = vmatprep.subr.bf16.mxu1 %v1789_v29 }
  0x38   :  { %1507 = vmatmul.mubr.msk.bf16.gmra.mxu0 %vm95_vm0, %v61_v17 }
  0x39   :  { %170 = vmatprep.mubr.bf16.mxu0 %v2087_v0 }
  0x3a   :  { %1594 = vmatpush3.bf16.msra.mxu1 %v1790_v30 }
  0x3b   :  { %1595 = vmatprep.subr.bf16.mxu1 %v1791_v31 }
  0x3e   :  { %1596 = vmatpush3.bf16.msra.mxu1 %v1792_v32 }
  0x40   :  { %1508 = vmatmul.mubr.msk.bf16.gmra.mxu0 %vm95_vm0, %v62_v20 }
  0xe8   :  { %v142_v39 = vpop.f32.mrf.mxu0 }
  0xe9   :  { %v143_v45 = vadd.f32 %v142_v39, %v68_v40 }
  0xea   :  { %v144_v41 = vpop.f32.mrf.mxu0 }
  0xeb   :  { %v145_v42 = vadd.f32 %v144_v41, %v72_v38 }
  0xec   :  { %v146_v43 = vpop.f32.mrf.mxu0 }
  0xed   :  { %v147_v44 = vadd.f32 %v146_v43, %v68_v40  ;;  %1849 = vtanh.f32 %v145_v42 }
  0xee   :  { %v148_v46 = vpop.f32.mrf.mxu0 }
  0xef   :  { %v149_v47 = vadd.f32 %v148_v46, %v72_v38  ;;  %1851 = vtanh.f32 %v147_v44  ;;  %v1794_v44 = vld [vmem:[#allocation2 + $0x180] ss:$8 sps:$4 sm:$0xff]  }
  0xf0   :  { %v152_v48 = vpop.f32.mrf.mxu0  ;;  %v1796_v46 = vld [vmem:[#allocation2 + $0x160] ss:$8 sps:$4 sm:$0xff]  }
  0xf1   :  { %1853 = vtanh.f32 %v149_v47  ;;  %v153_v53 = vadd.f32 %v152_v48, %v68_v40  ;;  %v1797_v47 = vld [vmem:[#allocation2 + $0x150] ss:$8 sps:$4 sm:$0xff]   ;;  %v1798_v48 = vld [vmem:[#allocation2 + $0x140] ss:$8 sps:$4 sm:$0xff]  }
  0xf2   :  { %1855 = vtanh.f32 %v143_v45  ;;  %v154_v49 = vpop.f32.mrf.mxu0  ;;  %v1795_v45 = vld [vmem:[#allocation2 + $0x170] ss:$8 sps:$4 sm:$0xff]  }
  0xf3   :  { %v155_v50 = vadd.f32 %v154_v49, %v72_v38  ;;  %v1799_v49 = vld [vmem:[#allocation2 + $0x130] ss:$8 sps:$4 sm:$0xff]  }
  0xf4   :  { %v156_v51 = vpop.f32.mrf.mxu0 }
  0xf5   :  { %v157_v52 = vadd.f32 %v156_v51, %v68_v40  ;;  %1857 = vtanh.f32 %v155_v50  ;;  %v1800_v50 = vld [vmem:[#allocation2 + $0x120] ss:$8 sps:$4 sm:$0xff]  }
  0xf6   :  { %v158_v54 = vpop.f32.mrf.mxu0 }
  0xf7   :  { %v159_v55 = vadd.f32 %v158_v54, %v72_v38  ;;  %1859 = vtanh.f32 %v157_v52 }
  0xf8   :  { %v162_v56 = vpop.f32.mrf.mxu0 }
  0xf9   :  { %1861 = vtanh.f32 %v159_v55  ;;  %v163_v57 = vadd.f32 %v162_v56, %v68_v40 }
  0xfa   :  { %1863 = vtanh.f32 %v153_v53  ;;  %v164_v58 = vpop.f32.mrf.mxu0  ;;  %v1850_v60 = vpop.eup %1849  ;;  %v237_v53 = vld [vmem:[#allocation5 + $0x10] ss:$0 sm:$0xff] }
  0xfb   :  { %v165_v59 = vadd.f32 %v164_v58, %v72_v38  ;;  %1865 = vtanh.f32 %v163_v57 }
  0xfc   :  { %v166_v61 = vpop.f32.mrf.mxu0  ;;  %v1852_v62 = vpop.eup %1851 }
  0xfd   :  { %v167_v63 = vadd.f32 %v166_v61, %v68_v40  ;;  %1867 = vtanh.f32 %v165_v59 }
  0xfe   :  { %v1854_v1 = vpop.eup %1853  ;;  %v168_v2 = vpop.f32.mrf.mxu0 }
  0xff   :  { %v1856_v3 = vpop.eup %1855  ;;  %1869 = vtanh.f32 %v167_v63  ;;  %v169_v4 = vadd.f32 %v168_v2, %v72_v38  ;;  %v230_v7 = vpack.c.bf16 %v1854_v1, %v1850_v60 }
 0x100   :  { %v172_v8 = vpop.f32.mrf.mxu0  ;;  %v229_v9 = vpack.c.bf16 %v1852_v62, %v1856_v3 }
 0x101   :  { %1871 = vtanh.f32 %v169_v4  ;;  %v173_v10 = vadd.f32 %v172_v8, %v68_v40  ;;  %366 = vmatprep.mubr.bf16.mxu1 %v230_v7 }
 0x102   :  { %v174_v13 = vpop.f32.mrf.mxu0  ;;  %367 = vmatmul.mubr.bf16.vlgmr.msra.gmra.mxu1 %v229_v9  ;;  %v1858_v17 = vpop.eup %1857 }
 0x103   :  { %v175_v14 = vadd.f32 %v174_v13, %v72_v38  ;;  %1873 = vtanh.f32 %v173_v10 }
 0x104   :  { %v176_v20 = vpop.f32.mrf.mxu0  ;;  %v1860_v21 = vpop.eup %1859 }
 0x105   :  { %v177_v22 = vadd.f32 %v176_v20, %v68_v40  ;;  %1875 = vtanh.f32 %v175_v14 }
 0x106   :  { %v1862_v23 = vpop.eup %1861  ;;  %v178_v24 = vpop.f32.mrf.mxu0 }
 0x107   :  { %v1864_v25 = vpop.eup %1863  ;;  %1877 = vtanh.f32 %v177_v22  ;;  %v179_v26 = vadd.f32 %v178_v24, %v72_v38  ;;  %v232_v27 = vpack.c.bf16 %v1862_v23, %v1858_v17  ;;  %v1793_v38 = vld [vmem:[#allocation2 + $0x190] ss:$8 sps:$4 sm:$0xff]  }
 0x108   :  { %v231_v28 = vpack.c.bf16 %v1860_v21, %v1864_v25  ;;  %v1866_v29 = vpop.eup %1865  ;;  %1689 = vmatprep.subr.bf16.mxu0 %v1793_v38 }
 0x109   :  { %1879 = vtanh.f32 %v179_v26  ;;  %374 = vmatprep.mubr.bf16.mxu1 %v232_v27  ;;  %1690 = vmatpush3.bf16.msra.mxu0 %v1793_v38  ;;  %v1801_v38 = vld [vmem:[#allocation2 + $0x1d0] ss:$8 sps:$4 sm:$0xff]  }
 0x10a   :  { %375 = vmatmul.mubr.bf16.gmra.mxu1 %v231_v28  ;;  %v1868_v30 = vpop.eup %1867  ;;  %1691 = vmatprep.subr.bf16.mxu0 %v1794_v44 }
 0x10c   :  { %v1870_v31 = vpop.eup %1869 }
 0x10d   :  { %v233_v33 = vpack.c.bf16 %v1870_v31, %v1866_v29  ;;  %1692 = vmatpush3.bf16.msra.mxu0 %v1794_v44  ;;  %v1802_v44 = vld [vmem:[#allocation2 + $0x1c0] ss:$8 sps:$4 sm:$0xff]  }
 0x10e   :  { %v1872_v32 = vpop.eup %1871  ;;  %1693 = vmatprep.subr.bf16.mxu0 %v1795_v45 }
 0x10f   :  { %v234_v34 = vpack.c.bf16 %v1872_v32, %v1868_v30 }
 0x110   :  { %v1874_v36 = vpop.eup %1873 }
 0x111   :  { %382 = vmatprep.mubr.bf16.mxu1 %v234_v34  ;;  %1694 = vmatpush3.bf16.msra.mxu0 %v1795_v45  ;;  %v1803_v45 = vld [vmem:[#allocation2 + $0x1b0] ss:$8 sps:$4 sm:$0xff]  }
 0x112   :  { %383 = vmatmul.mubr.bf16.gmra.mxu1 %v233_v33  ;;  %v1876_v39 = vpop.eup %1875  ;;  %1695 = vmatprep.subr.bf16.mxu0 %v1796_v46 }
 0x114   :  { %v1878_v40 = vpop.eup %1877 }
 0x115   :  { %v235_v42 = vpack.c.bf16 %v1878_v40, %v1874_v36  ;;  %1696 = vmatpush3.bf16.msra.mxu0 %v1796_v46  ;;  %v1804_v46 = vld [vmem:[#allocation2 + $0x1a0] ss:$8 sps:$4 sm:$0xff]  }
 0x116   :  { %v1880_v41 = vpop.eup %1879  ;;  %1697 = vmatprep.subr.bf16.mxu0 %v1797_v47 }
 0x117   :  { %v236_v43 = vpack.c.bf16 %v1880_v41, %v1876_v39 }
 0x119   :  { %390 = vmatprep.mubr.bf16.mxu1 %v236_v43  ;;  %1698 = vmatpush3.bf16.msra.mxu0 %v1797_v47 }
 0x11a   :  { %391 = vmatmul.mubr.bf16.gmra.mxu1 %v235_v42  ;;  %1699 = vmatprep.subr.bf16.mxu0 %v1798_v48 }
 0x11d   :  { %1700 = vmatpush3.bf16.msra.mxu0 %v1798_v48  ;;  %v427_v48 = vld [vmem:[#allocation5 + $0x20] ss:$0 sm:$0xff] }
 0x11e   :  { %1701 = vmatprep.subr.bf16.mxu0 %v1799_v49 }
 0x121   :  { %1702 = vmatpush3.bf16.msra.mxu0 %v1799_v49 }
 0x122   :  { %1703 = vmatprep.subr.bf16.mxu0 %v1800_v50 }
 0x125   :  { %1704 = vmatpush3.bf16.msra.mxu0 %v1800_v50 }
 0x126   :  { %1713 = vmatprep.subr.bf16.mxu0 %v1801_v38 }
 0x1c2   :  { %v1597_v51 = vpop.f32.mrf.mxu1 }
 0x1c4   :  { %v1598_v52 = vpop.f32.mrf.mxu1 }
 0x1c5   :  { %v1599_v54 = vadd.f32 %v1598_v52, %v1597_v51 }
 0x1c6   :  { %v1600_v55 = vpop.f32.mrf.mxu1 }
 0x1c7   :  { %v369_v56 = vadd.f32 %v1599_v54, %v237_v53 }
 0x1c8   :  { %v1601_v57 = vpop.f32.mrf.mxu1 }
 0x1c9   :  { %v1602_v58 = vadd.f32 %v1601_v57, %v1600_v55  ;;  %1881 = vtanh.f32 %v369_v56 }
 0x1ca   :  { %v1603_v59 = vpop.f32.mrf.mxu1 }
 0x1cb   :  { %v372_v60 = vadd.f32 %v1602_v58, %v237_v53 }
 0x1cc   :  { %v1604_v61 = vpop.f32.mrf.mxu1 }
 0x1cd   :  { %1883 = vtanh.f32 %v372_v60  ;;  %v1605_v62 = vadd.f32 %v1604_v61, %v1603_v59 }
 0x1ce   :  { %v1606_v63 = vpop.f32.mrf.mxu1 }
 0x1cf   :  { %v377_v1 = vadd.f32 %v1605_v62, %v237_v53 }
 0x1d0   :  { %v1607_v2 = vpop.f32.mrf.mxu1 }
 0x1d1   :  { %v1608_v3 = vadd.f32 %v1607_v2, %v1606_v63  ;;  %1885 = vtanh.f32 %v377_v1 }
 0x1d2   :  { %v1609_v4 = vpop.f32.mrf.mxu1 }
 0x1d3   :  { %v380_v7 = vadd.f32 %v1608_v3, %v237_v53 }
 0x1d4   :  { %v1610_v8 = vpop.f32.mrf.mxu1 }
 0x1d5   :  { %1887 = vtanh.f32 %v380_v7  ;;  %v1611_v9 = vadd.f32 %v1610_v8, %v1609_v4  ;;  %v561_v7 = vld [vmem:[#allocation5 + $0x30] ss:$0 sm:$0xff] }
 0x1d6   :  { %v1612_v10 = vpop.f32.mrf.mxu1  ;;  %v1882_v17 = vpop.eup %1881 }
 0x1d7   :  { %v385_v13 = vadd.f32 %v1611_v9, %v237_v53 }
 0x1d8   :  { %v1613_v14 = vpop.f32.mrf.mxu1 }
 0x1d9   :  { %v1614_v20 = vadd.f32 %v1613_v14, %v1612_v10  ;;  %1889 = vtanh.f32 %v385_v13 }
 0x1da   :  { %v1884_v21 = vpop.eup %1883  ;;  %v1615_v22 = vpop.f32.mrf.mxu1 }
 0x1db   :  { %v388_v23 = vadd.f32 %v1614_v20, %v237_v53  ;;  %v423_v24 = vpack.c.bf16 %v1884_v21, %v1882_v17 }
 0x1dc   :  { %v1616_v25 = vpop.f32.mrf.mxu1 }
 0x1dd   :  { %1891 = vtanh.f32 %v388_v23  ;;  %v1617_v26 = vadd.f32 %v1616_v25, %v1615_v22  ;;  %1705 = vmatprep.mubr.bf16.mxu0 %v423_v24 }
 0x1de   :  { %v1618_v27 = vpop.f32.mrf.mxu1  ;;  %v1886_v30 = vpop.eup %1885 }
 0x1df   :  { %v393_v28 = vadd.f32 %v1617_v26, %v237_v53  ;;  %v2089_v26 = vmov 1  }
 0x1e0   :  { %v1619_v29 = vpop.f32.mrf.mxu1  ;;  %1759 = vset.pattern.permute.xlu0 %v2089_v26 }
 0x1e1   :  { %v1620_v31 = vadd.f32 %v1619_v29, %v1618_v27  ;;  %1893 = vtanh.f32 %v393_v28  ;;  %v689_v28 = vpop.permute.xlu0 %688 }
 0x1e2   :  { %v1888_v32 = vpop.eup %1887 }
 0x1e3   :  { %v396_v33 = vadd.f32 %v1620_v31, %v237_v53  ;;  %v424_v34 = vpack.c.bf16 %v1888_v32, %v1886_v30 }
 0x1e5   :  { %1895 = vtanh.f32 %v396_v33  ;;  %1706 = vmatmul.mubr.bf16.vlgmr.msra.gmra.mxu0 %v424_v34  ;;  %v693_v33 = vpop.permute.xlu1 %692 }
 0x1e6   :  { %v1890_v36 = vpop.eup %1889  ;;  %1714 = vmatpush3.bf16.msra.mxu0 %v1801_v38  ;;  %v691_v38 = vpop.permute.xlu0 %690 }
 0x1e7   :  { %1715 = vmatprep.subr.bf16.mxu0 %v1802_v44 }
 0x1ea   :  { %v1892_v39 = vpop.eup %1891  ;;  %1716 = vmatpush3.bf16.msra.mxu0 %v1802_v44 }
 0x1eb   :  { %v425_v40 = vpack.c.bf16 %v1892_v39, %v1890_v36  ;;  %1717 = vmatprep.subr.bf16.mxu0 %v1803_v45 }
 0x1ed   :  { %1709 = vmatprep.mubr.bf16.mxu0 %v425_v40 }
 0x1ee   :  { %v1894_v41 = vpop.eup %1893  ;;  %1718 = vmatpush3.bf16.msra.mxu0 %v1803_v45 }
 0x1ef   :  { %1719 = vmatprep.subr.bf16.mxu0 %v1804_v46 }
 0x1f2   :  { %v1896_v42 = vpop.eup %1895  ;;  %1720 = vmatpush3.bf16.msra.mxu0 %v1804_v46 }
 0x1f3   :  { %v426_v43 = vpack.c.bf16 %v1896_v42, %v1894_v41 }
 0x1f5   :  { %1710 = vmatmul.mubr.bf16.gmra.mxu0 %v426_v43 }
 0x2a5   :  { %v1707_v47 = vpop.f32.mrf.mxu0 }
 0x2a6   :  { %v519_v52 = vadd.f32 %v1707_v47, %v427_v48 }
 0x2a7   :  { %v510_v49 = vpop.f32.mrf.mxu0 }
 0x2a8   :  { %v511_v50 = vadd.f32 %v510_v49, %v427_v48 }
 0x2a9   :  { %v1708_v51 = vpop.f32.mrf.mxu0 }
 0x2aa   :  { %v522_v11 = vadd.f32 %v1708_v51, %v427_v48  ;;  %1897 = vtanh.f32 %v511_v50  ;;  %v695_v51 = vpop.permute.xlu1 %694 }
 0x2ab   :  { %v513_v5 = vpop.f32.mrf.mxu0 }
 0x2ac   :  { %v514_v12 = vadd.f32 %v513_v5, %v427_v48  ;;  %1899 = vtanh.f32 %v522_v11 }
 0x2ae   :  { %1901 = vtanh.f32 %v514_v12  ;;  %v699_v12 = vpop.permute.xlu1 %698 }
 0x2af   :  { %1903 = vtanh.f32 %v519_v52  ;;  %v697_v52 = vpop.permute.xlu0 %696 }
 0x2b5   :  { %v1711_v6 = vpop.f32.mrf.mxu0 }
 0x2b6   :  { %v535_v56 = vadd.f32 %v1711_v6, %v427_v48 }
 0x2b7   :  { %v526_v15 = vpop.f32.mrf.mxu0  ;;  %v1898_v53 = vpop.eup %1897 }
 0x2b8   :  { %v527_v16 = vadd.f32 %v526_v15, %v427_v48 }
 0x2b9   :  { %v1712_v18 = vpop.f32.mrf.mxu0  ;;  %v1900_v54 = vpop.eup %1899 }
 0x2ba   :  { %v538_v19 = vadd.f32 %v1712_v18, %v427_v48  ;;  %1905 = vtanh.f32 %v527_v16  ;;  %v701_v16 = vpop.permute.xlu0 %700 }
 0x2bb   :  { %v1902_v55 = vpop.eup %1901  ;;  %v529_v57 = vpop.f32.mrf.mxu0 }
 0x2bc   :  { %v1904_v58 = vpop.eup %1903  ;;  %v530_v59 = vadd.f32 %v529_v57, %v427_v48  ;;  %v557_v60 = vpack.c.bf16 %v1902_v55, %v1898_v53  ;;  %1907 = vtanh.f32 %v538_v19  ;;  %v703_v55 = vpop.permute.xlu1 %702 }
 0x2bd   :  { %v558_v61 = vpack.c.bf16 %v1900_v54, %v1904_v58 }
 0x2be   :  { %1909 = vtanh.f32 %v530_v59  ;;  %1721 = vmatprep.mubr.msk.bf16.mxu0 %vm586_vm1, %v557_v60 }
 0x2bf   :  { %1911 = vtanh.f32 %v535_v56  ;;  %1722 = vmatmul.mubr.msk.bf16.vlgmr.msra.gmra.mxu0 %vm586_vm1, %v558_v61 }
 0x2c7   :  { %v1906_v62 = vpop.eup %1905 }
 0x2c9   :  { %v1908_v63 = vpop.eup %1907 }
 0x2cb   :  { %v1910_v1 = vpop.eup %1909 }
 0x2cc   :  { %v1912_v2 = vpop.eup %1911  ;;  %v559_v3 = vpack.c.bf16 %v1910_v1, %v1906_v62 }
 0x2cd   :  { %v560_v4 = vpack.c.bf16 %v1908_v63, %v1912_v2 }
 0x2ce   :  { %1725 = vmatprep.mubr.msk.bf16.mxu0 %vm586_vm1, %v559_v3 }
 0x2cf   :  { %1726 = vmatmul.mubr.msk.bf16.gmra.mxu0 %vm586_vm1, %v560_v4 }
 0x2d0   :  { %1200 = vmatprep.mubr.bf16.mxu0 %v2087_v0 }
 0x37f   :  { %v1723_v8 = vpop.f32.mrf.mxu0 }
 0x380   :  { %v2204_v9 = vadd.f32 %v1723_v8, %v561_v7 }
 0x381   :  { %v633_v10 = vpop.f32.mrf.mxu0 }
 0x382   :  { %v2206_v13 = vadd.f32 %v633_v10, %v561_v7  ;;  %v668_v14 = vmul.f32 1.442695, %v2204_v9 }
 0x383   :  { %v1724_v17 = vpop.f32.mrf.mxu0 }
 0x384   :  { %v664_v20 = vmul.f32 1.442695, %v2206_v13  ;;  %v2210_v21 = vadd.f32 %v1724_v17, %v561_v7  ;;  %v1806_v17 = vld [vmem:[#allocation2 + $0x210] ss:$8 sps:$4 sm:$0xff]  }
 0x385   :  { %v636_v22 = vpop.f32.mrf.mxu0 }
 0x386   :  { %1913 = vpow2.f32 %v664_v20  ;;  %v2212_v23 = vadd.f32 %v636_v22, %v561_v7  ;;  %v670_v24 = vmul.f32 1.442695, %v2210_v21  ;;  %v1807_v22 = vld [vmem:[#allocation2 + $0x200] ss:$8 sps:$4 sm:$0xff]  }
 0x387   :  { %1915 = vpow2.f32 %v668_v14 }
 0x388   :  { %v666_v25 = vmul.f32 1.442695, %v2212_v23 }
 0x38a   :  { %1917 = vpow2.f32 %v666_v25  ;;  %v1808_v25 = vld [vmem:[#allocation2 + $0x1f0] ss:$8 sps:$4 sm:$0xff]  }
 0x38b   :  { %1919 = vpow2.f32 %v670_v24 }
 0x38f   :  { %v1727_v27 = vpop.f32.mrf.mxu0 }
 0x390   :  { %v2217_v29 = vadd.f32 %v1727_v27, %v561_v7  ;;  %v1809_v27 = vld [vmem:[#allocation2 + $0x2a0] ss:$8 sps:$4 sm:$0xff]  }
 0x391   :  { %v649_v30 = vpop.f32.mrf.mxu0 }
 0x392   :  { %v2219_v31 = vadd.f32 %v649_v30, %v561_v7  ;;  %v676_v39 = vmul.f32 1.442695, %v2217_v29  ;;  %v1814_v30 = vld [vmem:[#allocation2 + $0x294] ss:$8 sps:$4 sm:$0xff]  }
 0x393   :  { %v1914_v32 = vpop.eup %1913  ;;  %v1728_v34 = vpop.f32.mrf.mxu0 }
 0x394   :  { %v1916_v36 = vpop.eup %1915  ;;  %v672_v40 = vmul.f32 1.442695, %v2219_v31  ;;  %v712_v41 = vmul.f32 %v1914_v32, %v689_v28  ;;  %v2223_v42 = vadd.f32 %v1728_v34, %v561_v7  ;;  %v1811_v28 = vld [vmem:[#allocation2 + $0x2a4] ss:$8 sps:$4 sm:$0xff]   ;;  %v1812_v32 = vld [vmem:[#allocation2 + $0x290] ss:$8 sps:$4 sm:$0xff]  }
 0x395   :  { %v652_v43 = vpop.f32.mrf.mxu0  ;;  %v714_v46 = vmul.f32 %v1916_v36, %v693_v33  ;;  %1168 = vmatprep.subr.bf16.mxu0 %v1811_v28  ;;  %v818_v36 = vld [vmem:[#allocation2 + $0x1e0] sm:$0x1] }
 0x396   :  { %1921 = vpow2.f32 %v672_v40  ;;  %v2225_v44 = vadd.f32 %v652_v43, %v561_v7  ;;  %728 = vrot.lane.b32.xlu0 %v712_v41, %s2090_s17  ;;  %v678_v47 = vmul.f32 1.442695, %v2223_v42  ;;  %v1805_v7 = vld [vmem:[#allocation2 + $0x220] ss:$8 sps:$4 sm:$0xff]   ;;  %1169 = vmatpush1.bf16.msra.mxu0 %v1809_v27  ;;  %v819_v41 = vunpack.c.l.bf16 %v818_v36 }
 0x397   :  { %v1918_v45 = vpop.eup %1917  ;;  %1923 = vpow2.f32 %v676_v39  ;;  %1729 = vmatprep.subr.bf16.mxu1 %v1805_v7  ;;  %1170 = vmatprep.subr.bf16.mxu0 %v1814_v30 }
 0x398   :  { %v674_v48 = vmul.f32 1.442695, %v2225_v44  ;;  %v713_v49 = vmul.f32 %v1918_v45, %v691_v38  ;;  %v1920_v50 = vpop.eup %1919  ;;  %1730 = vmatpush3.bf16.msra.mxu1 %v1805_v7  ;;  %v2257_v38 = vrot.slane %v819_v41, %v2187_v37  ;;  %v2260_v45 = vrot.slane %v819_v41, %v2185_v35 }
 0x399   :  { %v715_v11 = vmul.f32 %v1920_v50, %v695_v51  ;;  %1731 = vmatprep.subr.bf16.mxu1 %v1806_v17 }
 0x39a   :  { %1925 = vpow2.f32 %v674_v48  ;;  %730 = vrot.lane.b32.xlu1 %v713_v49, %s2090_s17  ;;  %732 = vrot.lane.b32.xlu0 %v714_v46, %s2090_s17 }
 0x39b   :  { %1927 = vpow2.f32 %v678_v47  ;;  %1171 = vmatpush1.bf16.msra.mxu0 %v1812_v32 }
 0x39c   :  { %1732 = vmatpush3.bf16.msra.mxu1 %v1806_v17 }
 0x39d   :  { %1733 = vmatprep.subr.bf16.mxu1 %v1807_v22 }
 0x39e   :  { %734 = vrot.lane.b32.xlu1 %v715_v11, %s2090_s17 }
 0x3a0   :  { %1734 = vmatpush3.bf16.msra.mxu1 %v1807_v22 }
 0x3a1   :  { %1735 = vmatprep.subr.bf16.mxu1 %v1808_v25 }
 0x3a3   :  { %v1922_v5 = vpop.eup %1921 }
 0x3a4   :  { %v716_v6 = vmul.f32 %v1922_v5, %v697_v52  ;;  %v1924_v15 = vpop.eup %1923  ;;  %1736 = vmatpush3.bf16.msra.mxu1 %v1808_v25 }
 0x3a5   :  { %v718_v54 = vmul.f32 %v1924_v15, %v701_v16 }
 0x3a6   :  { %736 = vrot.lane.b32.xlu0 %v716_v6, %s2090_s17  ;;  %v2268_v6 = vld [vmem:[#allocation5 + $0x40] ss:$0 sm:$0xff] }
 0x3a7   :  { %v1926_v53 = vpop.eup %1925 }
 0x3a8   :  { %v717_v18 = vmul.f32 %v1926_v53, %v699_v12  ;;  %v1928_v19 = vpop.eup %1927 }
 0x3a9   :  { %v719_v56 = vmul.f32 %v1928_v19, %v703_v55 }
 0x3aa   :  { %738 = vrot.lane.b32.xlu1 %v717_v18, %s2090_s17  ;;  %740 = vrot.lane.b32.xlu0 %v718_v54, %s2090_s17 }
 0x3ae   :  { %742 = vrot.lane.b32.xlu1 %v719_v56, %s2090_s17 }
 0x408   :  { %v729_v57 = vpop.permute.xlu0 %728 }
 0x409   :  { %v752_v61 = vadd.f32 %v729_v57, %v2206_v13 }
 0x40c   :  { %v733_v58 = vpop.permute.xlu0 %732  ;;  %v731_v60 = vpop.permute.xlu1 %730 }
 0x40d   :  { %v754_v59 = vadd.f32 %v733_v58, %v2204_v9  ;;  %v753_v63 = vadd.f32 %v731_v60, %v2212_v23 }
 0x40f   :  { %873 = vperm.xlu0 %1759, %v754_v59   ;;  %829 = vperm.xlu1 %1758, %v754_v59  }
 0x410   :  { %v735_v62 = vpop.permute.xlu1 %734 }
 0x411   :  { %v755_v1 = vadd.f32 %v735_v62, %v2210_v21 }
 0x413   :  { %1760 = vset.pattern.permute.xlu0 %v2087_v0  ;;  %1761 = vset.pattern.permute.xlu1 %v2089_v26 }
 0x414   :  { %821 = vperm.xlu0 %1760, %v752_v61   ;;  %865 = vperm.xlu1 %1761, %v752_v61  }
 0x418   :  { %1765 = vset.pattern.permute.xlu0 %v2089_v26  ;;  %1762 = vset.pattern.permute.xlu1 %v2087_v0  ;;  %v737_v2 = vpop.permute.xlu0 %736 }
 0x419   :  { %869 = vperm.xlu0 %1765, %v753_v63   ;;  %833 = vperm.xlu1 %1762, %v755_v1   ;;  %v756_v3 = vadd.f32 %v737_v2, %v2219_v31 }
 0x41c   :  { %v739_v4 = vpop.permute.xlu1 %738  ;;  %v741_v10 = vpop.permute.xlu0 %740 }
 0x41d   :  { %1766 = vset.pattern.permute.xlu0 %v2087_v0  ;;  %1763 = vset.pattern.permute.xlu1 %v2089_v26  ;;  %v757_v8 = vadd.f32 %v739_v4, %v2225_v44  ;;  %v758_v14 = vadd.f32 %v741_v10, %v2217_v29 }
 0x41e   :  { %877 = vperm.xlu1 %1763, %v755_v1   ;;  %837 = vperm.xlu0 %1766, %v756_v3  }
 0x420   :  { %v743_v20 = vpop.permute.xlu1 %742 }
 0x421   :  { %v759_v24 = vadd.f32 %v743_v20, %v2223_v42 }
 0x422   :  { %1764 = vset.pattern.permute.xlu1 %v2087_v0  ;;  %1769 = vset.pattern.permute.xlu0 %v2089_v26 }
 0x423   :  { %825 = vperm.xlu1 %1764, %v753_v63   ;;  %885 = vperm.xlu0 %1769, %v757_v8  }
 0x427   :  { %889 = vperm.xlu0 %1769, %v758_v14   ;;  %845 = vperm.xlu1 %1764, %v758_v14  }
 0x42b   :  { %768 = vrot.lane.b32.xlu0 %v752_v61, %s2091_s20  ;;  %1767 = vset.pattern.permute.xlu1 %v2089_v26 }
 0x42c   :  { %881 = vperm.xlu1 %1767, %v756_v3  }
 0x42f   :  { %772 = vrot.lane.b32.xlu0 %v754_v59, %s2091_s20 }
 0x430   :  { %1768 = vset.pattern.permute.xlu1 %v2087_v0 }
 0x431   :  { %849 = vperm.xlu1 %1768, %v759_v24  }
 0x433   :  { %776 = vrot.lane.b32.xlu0 %v756_v3, %s2091_s20 }
 0x435   :  { %841 = vperm.xlu1 %1768, %v757_v8  }
 0x437   :  { %780 = vrot.lane.b32.xlu0 %v758_v14, %s2091_s20 }
 0x439   :  { %1770 = vset.pattern.permute.xlu1 %v2089_v26 }
 0x43a   :  { %893 = vperm.xlu1 %1770, %v759_v24  }
 0x43e   :  { %770 = vrot.lane.b32.xlu1 %v753_v63, %s2091_s20 }
 0x442   :  { %774 = vrot.lane.b32.xlu1 %v755_v1, %s2091_s20 }
 0x446   :  { %778 = vrot.lane.b32.xlu1 %v757_v8, %s2091_s20 }
 0x44a   :  { %782 = vrot.lane.b32.xlu1 %v759_v24, %s2091_s20 }
 0x48a   :  { %v830_v33 = vpop.permute.xlu1 %829  ;;  %v874_v34 = vpop.permute.xlu0 %873 }
 0x48b   :  { %v858_v50 = vmul.f32 %v2257_v38, %v830_v33  ;;  %v902_v51 = vmul.f32 %v2260_v45, %v874_v34 }
 0x48d   :  { %v910_v15 = vadd.f32 %v902_v51, %v858_v50 }
 0x48f   :  { %v866_v39 = vpop.permute.xlu1 %865  ;;  %v822_v40 = vpop.permute.xlu0 %821  ;;  %v919_v57 = vadd.f32 %v2268_v6, %v910_v15 }
 0x490   :  { %v900_v46 = vmul.f32 %v2260_v45, %v866_v39  ;;  %v856_v47 = vmul.f32 %v2257_v38, %v822_v40 }
 0x492   :  { %v908_v5 = vadd.f32 %v900_v46, %v856_v47 }
 0x494   :  { %v834_v26 = vpop.permute.xlu1 %833  ;;  %v870_v43 = vpop.permute.xlu0 %869  ;;  %v917_v18 = vadd.f32 %v2268_v6, %v908_v5 }
 0x495   :  { %v859_v11 = vmul.f32 %v2257_v38, %v834_v26  ;;  %v901_v54 = vmul.f32 %v2260_v45, %v870_v43 }
 0x496   :  { %1929 = vtanh.f32 %v917_v18 }
 0x499   :  { %v878_v48 = vpop.permute.xlu1 %877  ;;  %v838_v49 = vpop.permute.xlu0 %837 }
 0x49a   :  { %v903_v52 = vmul.f32 %v2260_v45, %v878_v48  ;;  %v860_v7 = vmul.f32 %v2257_v38, %v838_v49 }
 0x49c   :  { %v911_v12 = vadd.f32 %v903_v52, %v859_v11 }
 0x49e   :  { %v826_v16 = vpop.permute.xlu1 %825  ;;  %v886_v53 = vpop.permute.xlu0 %885  ;;  %v920_v55 = vadd.f32 %v2268_v6, %v911_v12 }
 0x49f   :  { %v857_v19 = vmul.f32 %v2257_v38, %v826_v16  ;;  %v905_v28 = vmul.f32 %v2260_v45, %v886_v53 }
 0x4a0   :  { %1931 = vtanh.f32 %v920_v55 }
 0x4a1   :  { %v909_v56 = vadd.f32 %v901_v54, %v857_v19 }
 0x4a2   :  { %v846_v58 = vpop.permute.xlu1 %845  ;;  %v890_v59 = vpop.permute.xlu0 %889 }
 0x4a3   :  { %v918_v60 = vadd.f32 %v2268_v6, %v909_v56  ;;  %v906_v20 = vmul.f32 %v2260_v45, %v890_v59  ;;  %v1930_v24 = vpop.eup %1929  ;;  %v1820_v59 = vld [vmem:[#allocation2 + $0x274] ss:$8 sps:$4 sm:$0xff]  }
 0x4a5   :  { %1933 = vtanh.f32 %v918_v60  ;;  %v1818_v60 = vld [vmem:[#allocation2 + $0x270] ss:$8 sps:$4 sm:$0xff]  }
 0x4a6   :  { %1935 = vtanh.f32 %v919_v57  ;;  %v769_v61 = vpop.permute.xlu0 %768 }
 0x4a7   :  { %v793_v62 = vsel %vm792_vm2, %v2206_v13, %v769_v61  ;;  %v882_v63 = vpop.permute.xlu1 %881  ;;  %v862_v13 = vmul.f32 %v2257_v38, %v846_v58  ;;  %v1815_v58 = vld [vmem:[#allocation2 + $0x280] ss:$8 sps:$4 sm:$0xff]   ;;  %v1823_v61 = vld [vmem:[#allocation2 + $0x264] ss:$8 sps:$4 sm:$0xff]  }
 0x4a8   :  { %v802_v1 = vsel %vm801_vm3, %v793_v62, 0.0  ;;  %v904_v2 = vmul.f32 %v2260_v45, %v882_v63  ;;  %v1826_v62 = vld [vmem:[#allocation2 + $0x254] ss:$8 sps:$4 sm:$0xff]   ;;  %v1824_v63 = vld [vmem:[#allocation2 + $0x250] ss:$8 sps:$4 sm:$0xff]  }
 0x4a9   :  { %810 = vst [vmem:[#allocation7] sm:$0xff] %v802_v1  ;;  %v914_v39 = vadd.f32 %v906_v20, %v862_v13  ;;  %v1829_v1 = vld [vmem:[#allocation2 + $0x244] ss:$8 sps:$4 sm:$0xff]   ;;  %v945_v20 = vld [vmem:[#allocation5 + $0x50] ss:$0 sm:$0xff] }
 0x4aa   :  { %v773_v3 = vpop.permute.xlu0 %772  ;;  %v912_v14 = vadd.f32 %v904_v2, %v860_v7  ;;  %v1827_v2 = vld [vmem:[#allocation2 + $0x240] ss:$8 sps:$4 sm:$0xff]  }
 0x4ab   :  { %v795_v4 = vsel %vm792_vm2, %v2204_v9, %v773_v3  ;;  %v923_v50 = vadd.f32 %v2268_v6, %v914_v39  ;;  %v1832_v3 = vld [vmem:[#allocation2 + $0x234] ss:$8 sps:$4 sm:$0xff]   ;;  %v1833_v7 = vld [vmem:[#allocation2 + $0x3a0] ss:$8 sps:$4 sm:$0xff]  }
 0x4ac   :  { %v804_v8 = vsel %vm801_vm3, %v795_v4, 0.0  ;;  %v850_v10 = vpop.permute.xlu1 %849  ;;  %v921_v33 = vadd.f32 %v2268_v6, %v912_v14  ;;  %v1830_v4 = vld [vmem:[#allocation2 + $0x230] ss:$8 sps:$4 sm:$0xff]   ;;  %1649 = vmatprep.subr.bf16.mxu1 %v1833_v7 }
 0x4ad   :  { %812 = vst [vmem:[#allocation7 + $0x10] sm:$0xff] %v804_v8  ;;  %v1932_v9 = vpop.eup %1931  ;;  %v863_v48 = vmul.f32 %v2257_v38, %v850_v10  ;;  %v1834_v8 = vld [vmem:[#allocation2 + $0x320] ss:$8 sps:$4 sm:$0xff]   ;;  %v1835_v10 = vld [vmem:[#allocation2 + $0x390] ss:$8 sps:$4 sm:$0xff]  }
 0x4ae   :  { %v777_v17 = vpop.permute.xlu0 %776  ;;  %1937 = vtanh.f32 %v921_v33  ;;  %v1836_v14 = vld [vmem:[#allocation2 + $0x310] ss:$8 sps:$4 sm:$0xff]  }
 0x4af   :  { %v797_v22 = vsel %vm792_vm2, %v2219_v31, %v777_v17 }
 0x4b0   :  { %v806_v25 = vsel %vm801_vm3, %v797_v22, 0.0  ;;  %v842_v27 = vpop.permute.xlu1 %841 }
 0x4b1   :  { %814 = vst [vmem:[#allocation7 + $0x20] sm:$0xff] %v806_v25  ;;  %v861_v30 = vmul.f32 %v2257_v38, %v842_v27 }
 0x4b2   :  { %v1934_v32 = vpop.eup %1933  ;;  %v781_v34 = vpop.permute.xlu0 %780 }
 0x4b3   :  { %v1936_v36 = vpop.eup %1935  ;;  %v913_v40 = vadd.f32 %v905_v28, %v861_v30  ;;  %v799_v31 = vsel %vm792_vm2, %v2217_v29, %v781_v34  ;;  %v941_v41 = vpack.c.bf16 %v1934_v32, %v1930_v24 }
 0x4b4   :  { %v808_v26 = vsel %vm801_vm3, %v799_v31, 0.0  ;;  %v942_v43 = vpack.c.bf16 %v1932_v9, %v1936_v36 }
 0x4b5   :  { %v922_v46 = vadd.f32 %v2268_v6, %v913_v40  ;;  %816 = vst [vmem:[#allocation7 + $0x30] sm:$0xff] %v808_v26  ;;  %v894_v47 = vpop.permute.xlu1 %893  ;;  %1737 = vmatprep.mubr.msk.bf16.mxu1 %vm586_vm1, %v941_v41 }
 0x4b6   :  { %v907_v49 = vmul.f32 %v2260_v45, %v894_v47  ;;  %1738 = vmatmul.mubr.msk.bf16.vlgmr.msra.gmra.mxu1 %vm586_vm1, %v942_v43 }
 0x4b7   :  { %1939 = vtanh.f32 %v922_v46  ;;  %1650 = vmatpush3.bf16.msra.mxu1 %v1834_v8 }
 0x4b8   :  { %v915_v29 = vadd.f32 %v907_v49, %v863_v48  ;;  %1941 = vtanh.f32 %v923_v50  ;;  %1651 = vmatprep.subr.bf16.mxu1 %v1835_v10 }
 0x4b9   :  { %v771_v51 = vpop.permute.xlu1 %770 }
 0x4ba   :  { %v924_v11 = vadd.f32 %v2268_v6, %v915_v29  ;;  %v794_v52 = vsel %vm792_vm2, %v2212_v23, %v771_v51 }
 0x4bb   :  { %v803_v5 = vsel %vm801_vm3, %v794_v52, 0.0  ;;  %v1938_v6 = vpop.eup %1937  ;;  %1652 = vmatpush3.bf16.msra.mxu1 %v1836_v14 }
 0x4bc   :  { %1943 = vtanh.f32 %v924_v11  ;;  %811 = vst [vmem:[#allocation7 + $0x8] sm:$0xff] %v803_v5  ;;  %v1837_v5 = vld [vmem:[#allocation2 + $0x380] ss:$8 sps:$4 sm:$0xff]  }
 0x4bd   :  { %v775_v38 = vpop.permute.xlu1 %774  ;;  %1653 = vmatprep.subr.bf16.mxu1 %v1837_v5 }
 0x4be   :  { %v796_v45 = vsel %vm792_vm2, %v2210_v21, %v775_v38  ;;  %v1838_v38 = vld [vmem:[#allocation2 + $0x300] ss:$8 sps:$4 sm:$0xff]  }
 0x4bf   :  { %v805_v12 = vsel %vm801_vm3, %v796_v45, 0.0  ;;  %1654 = vmatpush3.bf16.msra.mxu1 %v1838_v38  ;;  %v1839_v45 = vld [vmem:[#allocation2 + $0x370] ss:$8 sps:$4 sm:$0xff]  }
 0x4c0   :  { %813 = vst [vmem:[#allocation7 + $0x18] sm:$0xff] %v805_v12  ;;  %v1840_v12 = vld [vmem:[#allocation2 + $0x2f0] ss:$8 sps:$4 sm:$0xff]   ;;  %1655 = vmatprep.subr.bf16.mxu1 %v1839_v45 }
 0x4c1   :  { %v779_v15 = vpop.permute.xlu1 %778 }
 0x4c2   :  { %v798_v16 = vsel %vm792_vm2, %v2225_v44, %v779_v15  ;;  %v1817_v44 = vld [vmem:[#allocation2 + $0x284] ss:$8 sps:$4 sm:$0xff]   ;;  %v1841_v15 = vld [vmem:[#allocation2 + $0x360] ss:$8 sps:$4 sm:$0xff]  }
 0x4c3   :  { %v807_v53 = vsel %vm801_vm3, %v798_v16, 0.0  ;;  %1172 = vmatprep.subr.bf16.mxu0 %v1817_v44  ;;  %1656 = vmatpush3.bf16.msra.mxu1 %v1840_v12  ;;  %v1842_v16 = vld [vmem:[#allocation2 + $0x2e0] ss:$8 sps:$4 sm:$0xff]  }
 0x4c4   :  { %v1940_v23 = vpop.eup %1939  ;;  %815 = vst [vmem:[#allocation7 + $0x28] sm:$0xff] %v807_v53  ;;  %1173 = vmatpush1.bf16.msra.mxu0 %v1815_v58  ;;  %1657 = vmatprep.subr.bf16.mxu1 %v1841_v15  ;;  %v1844_v53 = vld [vmem:[#allocation2 + $0x2d0] ss:$8 sps:$4 sm:$0xff]  }
 0x4c5   :  { %v783_v18 = vpop.permute.xlu1 %782  ;;  %v943_v54 = vpack.c.bf16 %v1940_v23, %v1938_v6  ;;  %v1942_v21 = vpop.eup %1941  ;;  %1174 = vmatprep.subr.bf16.mxu0 %v1820_v59  ;;  %v1843_v6 = vld [vmem:[#allocation2 + $0x350] ss:$8 sps:$4 sm:$0xff]   ;;  %v1846_v23 = vld [vmem:[#allocation2 + $0x2c0] ss:$8 sps:$4 sm:$0xff]  }
 0x4c6   :  { %v800_v19 = vsel %vm792_vm2, %v2223_v42, %v783_v18  ;;  %v1821_v42 = vld [vmem:[#allocation2 + $0x260] ss:$8 sps:$4 sm:$0xff]   ;;  %v1847_v18 = vld [vmem:[#allocation2 + $0x330] ss:$8 sps:$4 sm:$0xff]  }
 0x4c7   :  { %v809_v55 = vsel %vm801_vm3, %v800_v19, 0.0  ;;  %1741 = vmatprep.mubr.msk.bf16.mxu1 %vm586_vm1, %v943_v54  ;;  %1658 = vmatpush3.bf16.msra.mxu1 %v1842_v16  ;;  %v1848_v54 = vld [vmem:[#allocation2 + $0x2b0] ss:$8 sps:$4 sm:$0xff]  }
 0x4c8   :  { %817 = vst [vmem:[#allocation7 + $0x38] sm:$0xff] %v809_v55  ;;  %1175 = vmatpush1.bf16.msra.mxu0 %v1818_v60  ;;  %1659 = vmatprep.subr.bf16.mxu1 %v1843_v6  ;;  %v1076_v19 = vld [vmem:[#allocation5 + $0x60] ss:$8 sm:$0x3] }
 0x4c9   :  { %v1944_v56 = vpop.eup %1943  ;;  %1176 = vmatprep.subr.bf16.mxu0 %v1823_v61  ;;  %v1085_v55 = vrot.slane %v1076_v19, %v2185_v35 }
 0x4ca   :  { %v944_v57 = vpack.c.bf16 %v1944_v56, %v1942_v21  ;;  %v1081_v56 = vrot.slane %v1076_v19, %v2187_v37 }
 0x4cb   :  { %1660 = vmatpush3.bf16.msra.mxu1 %v1844_v53 }
 0x4cc   :  { %1742 = vmatmul.mubr.msk.bf16.gmra.mxu1 %vm586_vm1, %v944_v57  ;;  %1177 = vmatpush1.bf16.msra.mxu0 %v1821_v42 }
 0x4cd   :  { %1178 = vmatprep.subr.bf16.mxu0 %v1826_v62 }
 0x4d0   :  { %1179 = vmatpush1.bf16.msra.mxu0 %v1824_v63 }
 0x4d1   :  { %1180 = vmatprep.subr.bf16.mxu0 %v1829_v1 }
 0x4d4   :  { %1181 = vmatpush1.bf16.msra.mxu0 %v1827_v2 }
 0x4d5   :  { %1182 = vmatprep.subr.bf16.mxu0 %v1832_v3 }
 0x4d8   :  { %1183 = vmatpush1.bf16.msra.mxu0 %v1830_v4 }
 0x576   :  { %v1739_v17 = vpop.f32.mrf.mxu1 }
 0x577   :  { %v1025_v28 = vadd.f32 %v1739_v17, %v945_v20 }
 0x578   :  { %v1016_v13 = vpop.f32.mrf.mxu1 }
 0x579   :  { %v1017_v22 = vadd.f32 %v1016_v13, %v945_v20 }
 0x57a   :  { %v1740_v24 = vpop.f32.mrf.mxu1 }
 0x57b   :  { %1945 = vtanh.f32 %v1017_v22  ;;  %v1028_v9 = vadd.f32 %v1740_v24, %v945_v20 }
 0x57c   :  { %v1019_v25 = vpop.f32.mrf.mxu1 }
 0x57d   :  { %v1020_v27 = vadd.f32 %v1019_v25, %v945_v20 }
 0x57f   :  { %1947 = vtanh.f32 %v1020_v27 }
 0x580   :  { %1949 = vtanh.f32 %v1028_v9 }
 0x581   :  { %1951 = vtanh.f32 %v1025_v28 }
 0x588   :  { %v1946_v30 = vpop.eup %1945 }
 0x58c   :  { %v1948_v32 = vpop.eup %1947  ;;  %v1743_v33 = vpop.f32.mrf.mxu1 }
 0x58d   :  { %v1071_v34 = vpack.c.bf16 %v1948_v32, %v1946_v30  ;;  %v1950_v31 = vpop.eup %1949  ;;  %v1041_v48 = vadd.f32 %v1743_v33, %v945_v20 }
 0x58e   :  { %v1032_v36 = vpop.f32.mrf.mxu1  ;;  %v1952_v43 = vpop.eup %1951 }
 0x58f   :  { %1201 = vmatmul.mubr.bf16.vlgmr.msra.gmra.mxu0 %v1071_v34  ;;  %v1033_v39 = vadd.f32 %v1032_v36, %v945_v20  ;;  %v1072_v46 = vpack.c.bf16 %v1950_v31, %v1952_v43 }
 0x590   :  { %v1744_v40 = vpop.f32.mrf.mxu1  ;;  %1210 = vmatprep.mubr.bf16.mxu0 %v2087_v0 }
 0x591   :  { %1953 = vtanh.f32 %v1033_v39  ;;  %v1044_v47 = vadd.f32 %v1744_v40, %v945_v20 }
 0x592   :  { %v1035_v41 = vpop.f32.mrf.mxu1 }
 0x593   :  { %v1036_v26 = vadd.f32 %v1035_v41, %v945_v20 }
 0x595   :  { %1955 = vtanh.f32 %v1036_v26 }
 0x596   :  { %1957 = vtanh.f32 %v1044_v47 }
 0x597   :  { %1211 = vmatmul.mubr.bf16.gmra.mxu0 %v1072_v46  ;;  %1959 = vtanh.f32 %v1041_v48 }
 0x598   :  { %1220 = vmatprep.mubr.bf16.mxu0 %v2087_v0 }
 0x59e   :  { %v1954_v49 = vpop.eup %1953 }
 0x5a2   :  { %v1956_v50 = vpop.eup %1955 }
 0x5a3   :  { %v1073_v29 = vpack.c.bf16 %v1956_v50, %v1954_v49  ;;  %v1958_v51 = vpop.eup %1957 }
 0x5a4   :  { %v1960_v11 = vpop.eup %1959 }
 0x5a5   :  { %1221 = vmatmul.mubr.bf16.gmra.mxu0 %v1073_v29  ;;  %v1074_v52 = vpack.c.bf16 %v1958_v51, %v1960_v11 }
 0x5a6   :  { %1230 = vmatprep.mubr.bf16.mxu0 %v2087_v0  ;;  %v1845_v0 = vld [vmem:[#allocation2 + $0x340] ss:$8 sps:$4 sm:$0xff]  }
 0x5a7   :  { %1661 = vmatprep.subr.bf16.mxu1 %v1845_v0 }
 0x5a8   :  { %1662 = vmatpush3.bf16.msra.mxu1 %v1846_v23 }
 0x5a9   :  { %1663 = vmatprep.subr.bf16.mxu1 %v1847_v18 }
 0x5ac   :  { %1664 = vmatpush3.bf16.msra.mxu1 %v1848_v54 }
 0x5ad   :  { %1231 = vmatmul.mubr.bf16.gmra.mxu0 %v1074_v52 }
 0x64f   :  { %v1202_v21 = vpop.f32.mrf.mxu0 }
 0x650   :  { %v1203_v60 = vadd.f32 %v1202_v21, %v1081_v56 }
 0x651   :  { %v1204_v57 = vpop.f32.mrf.mxu0 }
 0x652   :  { %v1205_v44 = vadd.f32 %v1204_v57, %v1085_v55 }
 0x653   :  { %v1206_v58 = vpop.f32.mrf.mxu0 }
 0x654   :  { %v1207_v59 = vadd.f32 %v1206_v58, %v1081_v56  ;;  %1961 = vtanh.f32 %v1205_v44 }
 0x655   :  { %v1208_v61 = vpop.f32.mrf.mxu0 }
 0x656   :  { %v1209_v42 = vadd.f32 %v1208_v61, %v1085_v55  ;;  %1963 = vtanh.f32 %v1207_v59 }
 0x657   :  { %v1212_v62 = vpop.f32.mrf.mxu0 }
 0x658   :  { %1965 = vtanh.f32 %v1209_v42  ;;  %v1213_v35 = vadd.f32 %v1212_v62, %v1081_v56 }
 0x659   :  { %1967 = vtanh.f32 %v1203_v60  ;;  %v1214_v63 = vpop.f32.mrf.mxu0 }
 0x65a   :  { %v1215_v1 = vadd.f32 %v1214_v63, %v1085_v55 }
 0x65b   :  { %v1216_v2 = vpop.f32.mrf.mxu0 }
 0x65c   :  { %v1217_v3 = vadd.f32 %v1216_v2, %v1081_v56  ;;  %1969 = vtanh.f32 %v1215_v1 }
 0x65d   :  { %v1218_v4 = vpop.f32.mrf.mxu0 }
 0x65e   :  { %v1219_v37 = vadd.f32 %v1218_v4, %v1085_v55  ;;  %1971 = vtanh.f32 %v1217_v3 }
 0x660   :  { %1973 = vtanh.f32 %v1219_v37 }
 0x661   :  { %1975 = vtanh.f32 %v1213_v35  ;;  %v1962_v7 = vpop.eup %1961 }
 0x663   :  { %v1964_v8 = vpop.eup %1963 }
 0x665   :  { %v1966_v10 = vpop.eup %1965  ;;  %v1222_v14 = vpop.f32.mrf.mxu0 }
 0x666   :  { %v1968_v17 = vpop.eup %1967  ;;  %v1290_v13 = vpack.c.bf16 %v1966_v10, %v1962_v7  ;;  %v1223_v28 = vadd.f32 %v1222_v14, %v1081_v56 }
 0x667   :  { %v1224_v20 = vpop.f32.mrf.mxu0  ;;  %v1289_v22 = vpack.c.bf16 %v1964_v8, %v1968_v17 }
 0x668   :  { %v1225_v24 = vadd.f32 %v1224_v20, %v1085_v55  ;;  %1426 = vmatprep.mubr.bf16.mxu1 %v1290_v13 }
 0x669   :  { %v1226_v25 = vpop.f32.mrf.mxu0  ;;  %1427 = vmatmul.mubr.bf16.vlgmr.msra.gmra.mxu1 %v1289_v22  ;;  %v1970_v9 = vpop.eup %1969 }
 0x66a   :  { %v1227_v27 = vadd.f32 %v1226_v25, %v1081_v56  ;;  %1977 = vtanh.f32 %v1225_v24 }
 0x66b   :  { %v1228_v30 = vpop.f32.mrf.mxu0  ;;  %v1972_v32 = vpop.eup %1971 }
 0x66c   :  { %v1229_v33 = vadd.f32 %v1228_v30, %v1085_v55  ;;  %1979 = vtanh.f32 %v1227_v27 }
 0x66d   :  { %v1974_v34 = vpop.eup %1973  ;;  %v1232_v36 = vpop.f32.mrf.mxu0 }
 0x66e   :  { %v1976_v39 = vpop.eup %1975  ;;  %1981 = vtanh.f32 %v1229_v33  ;;  %v1292_v40 = vpack.c.bf16 %v1974_v34, %v1970_v9  ;;  %v1233_v47 = vadd.f32 %v1232_v36, %v1081_v56 }
 0x66f   :  { %1983 = vtanh.f32 %v1223_v28  ;;  %v1234_v31 = vpop.f32.mrf.mxu0  ;;  %v1291_v41 = vpack.c.bf16 %v1972_v32, %v1976_v39 }
 0x670   :  { %v1235_v26 = vadd.f32 %v1234_v31, %v1085_v55  ;;  %1434 = vmatprep.mubr.bf16.mxu1 %v1292_v40 }
 0x671   :  { %v1236_v43 = vpop.f32.mrf.mxu0  ;;  %1435 = vmatmul.mubr.bf16.gmra.mxu1 %v1291_v41 }
 0x672   :  { %v1237_v46 = vadd.f32 %v1236_v43, %v1081_v56  ;;  %1985 = vtanh.f32 %v1235_v26 }
 0x673   :  { %v1238_v48 = vpop.f32.mrf.mxu0 }
 0x674   :  { %v1239_v49 = vadd.f32 %v1238_v48, %v1085_v55  ;;  %1987 = vtanh.f32 %v1237_v46 }
 0x676   :  { %1989 = vtanh.f32 %v1239_v49 }
 0x677   :  { %1991 = vtanh.f32 %v1233_v47  ;;  %v1978_v50 = vpop.eup %1977 }
 0x679   :  { %v1980_v29 = vpop.eup %1979 }
 0x67b   :  { %v1982_v51 = vpop.eup %1981 }
 0x67c   :  { %v1984_v11 = vpop.eup %1983  ;;  %v1294_v52 = vpack.c.bf16 %v1982_v51, %v1978_v50 }
 0x67d   :  { %v1293_v5 = vpack.c.bf16 %v1980_v29, %v1984_v11 }
 0x67e   :  { %1442 = vmatprep.mubr.bf16.mxu1 %v1294_v52 }
 0x67f   :  { %1443 = vmatmul.mubr.bf16.gmra.mxu1 %v1293_v5  ;;  %v1986_v38 = vpop.eup %1985 }
 0x681   :  { %v1988_v45 = vpop.eup %1987 }
 0x683   :  { %v1990_v12 = vpop.eup %1989 }
 0x684   :  { %v1992_v15 = vpop.eup %1991  ;;  %v1296_v16 = vpack.c.bf16 %v1990_v12, %v1986_v38 }
 0x685   :  { %v1295_v6 = vpack.c.bf16 %v1988_v45, %v1992_v15 }
 0x686   :  { %1450 = vmatprep.mubr.bf16.mxu1 %v1296_v16 }
 0x687   :  { %1451 = vmatmul.mubr.bf16.gmra.mxu1 %v1295_v6 }
 0x688   :  { %2044 = shalt.err (!%p2041_p0)
}
 0x689   :  { %1478 = dma.vmem_to_hbm [thread:$0]  %s1473_s22, 1024, %s2336_s3, [#allocation4], %s2082_s18, %s2082_s18, %s2083_s19   ;;  %v1297_v0 = vld [vmem:[#allocation5 + $0x70] ss:$0 sm:$0xff] }
 0x68a   :  { %s2093_s3 = smov [#allocation8]  }
 0x68b   :  { %s1484_s26 = sshll.u32 %s2093_s3, 4  ;;  %s1485_s26 = int_to_ptr.vmem [resolvable:$true] %s1484_s26 }
 0x68c   :  { %s2053_s27 = scalar_lea.vmem %s1485_s26, 1024  ;;  %p2058_p2 = scmp.lt.s32.totalorder %s1485_s26, %s1485_s26 }
 0x68d   :  { %p2054_p1 = scmp.ne.s32.totalorder %s1485_s26, %s2053_s27  ;;  %p2059_p3 = scmp.lt.s32.totalorder %s2053_s27, %s2053_s27 }
 0x68f   :  { %p2060_p4 = por %p2059_p3, %p2058_p2 }
 0x691   :  { %p2061_p5 = pnand %p2060_p4, %p2054_p1 }
 0x729   :  { %v1665_v53 = vpop.f32.mrf.mxu1 }
 0x72b   :  { %v1666_v23 = vpop.f32.mrf.mxu1 }
 0x72c   :  { %v1667_v18 = vadd.f32 %v1666_v23, %v1665_v53 }
 0x72d   :  { %v1668_v54 = vpop.f32.mrf.mxu1 }
 0x72e   :  { %v1429_v19 = vadd.f32 %v1667_v18, %v1297_v0 }
 0x72f   :  { %v1669_v55 = vpop.f32.mrf.mxu1 }
 0x730   :  { %1459 = vst [vmem:[#allocation8] sm:$0xff] %v1429_v19  ;;  %v1670_v21 = vadd.f32 %v1669_v55, %v1668_v54 }
 0x731   :  { %v1671_v56 = vpop.f32.mrf.mxu1 }
 0x732   :  { %v1432_v57 = vadd.f32 %v1670_v21, %v1297_v0 }
 0x733   :  { %v1672_v44 = vpop.f32.mrf.mxu1 }
 0x734   :  { %1460 = vst [vmem:[#allocation8 + $0x8] sm:$0xff] %v1432_v57  ;;  %v1673_v58 = vadd.f32 %v1672_v44, %v1671_v56 }
 0x735   :  { %v1674_v59 = vpop.f32.mrf.mxu1 }
 0x736   :  { %v1437_v60 = vadd.f32 %v1673_v58, %v1297_v0 }
 0x737   :  { %v1675_v61 = vpop.f32.mrf.mxu1 }
 0x738   :  { %1461 = vst [vmem:[#allocation8 + $0x10] sm:$0xff] %v1437_v60  ;;  %v1676_v42 = vadd.f32 %v1675_v61, %v1674_v59 }
 0x73a   :  { %v1440_v62 = vadd.f32 %v1676_v42, %v1297_v0 }
 0x73c   :  { %1462 = vst [vmem:[#allocation8 + $0x18] sm:$0xff] %v1440_v62 }
 0x73f   :  { %v1677_v63 = vpop.f32.mrf.mxu1 }
 0x741   :  { %v1678_v1 = vpop.f32.mrf.mxu1 }
 0x742   :  { %v1679_v2 = vadd.f32 %v1678_v1, %v1677_v63 }
 0x743   :  { %v1680_v3 = vpop.f32.mrf.mxu1 }
 0x744   :  { %v1445_v35 = vadd.f32 %v1679_v2, %v1297_v0 }
 0x745   :  { %v1681_v4 = vpop.f32.mrf.mxu1 }
 0x746   :  { %1463 = vst [vmem:[#allocation8 + $0x20] sm:$0xff] %v1445_v35  ;;  %v1682_v37 = vadd.f32 %v1681_v4, %v1680_v3 }
 0x747   :  { %v1683_v7 = vpop.f32.mrf.mxu1 }
 0x748   :  { %v1448_v8 = vadd.f32 %v1682_v37, %v1297_v0 }
 0x749   :  { %v1684_v10 = vpop.f32.mrf.mxu1 }
 0x74a   :  { %1464 = vst [vmem:[#allocation8 + $0x28] sm:$0xff] %v1448_v8  ;;  %v1685_v14 = vadd.f32 %v1684_v10, %v1683_v7 }
 0x74b   :  { %v1686_v17 = vpop.f32.mrf.mxu1 }
 0x74c   :  { %v1453_v13 = vadd.f32 %v1685_v14, %v1297_v0 }
 0x74d   :  { %v1687_v20 = vpop.f32.mrf.mxu1 }
 0x74e   :  { %1465 = vst [vmem:[#allocation8 + $0x30] sm:$0xff] %v1453_v13  ;;  %v1688_v22 = vadd.f32 %v1687_v20, %v1686_v17 }
 0x750   :  { %v1456_v24 = vadd.f32 %v1688_v22, %v1297_v0 }
 0x752   :  { %1466 = vst [vmem:[#allocation8 + $0x38] sm:$0xff] %v1456_v24 }
 0x753   :  { %2064 = shalt.err (!%p2061_p5)
}
 0x754   :  { %1490 = dma.vmem_to_hbm [thread:$0]  %s1485_s26, 1024, %s2337_s4, [#allocation9], %s2082_s18, %s2082_s18, %s2083_s19  }
 0x755   :  { %2077 = dma.done.wait [#allocation4], 1024  }
 0x756   :  { %2078 = vsyncadd [#allocation4], 4294966272 }
 0x757   :  { %2079 = dma.done.wait [#allocation9], 1024  }
 0x758   :  { %2080 = vsyncadd [#allocation9], 4294966272 }
 0x759   :  { %1497 = vsyncpa [#allocation3], 1 }
 0x75a   :  { %1498 = vsyncpa [#allocation6], 1 }
 0x75b   :  { %1499 = vsyncpa [#allocation4], 1 }
 0x75c   :  { %1500 = vsyncpa [#allocation9], 1 }

</bundles_post_ra>
